<compile_context>
chip_gen: v6e
topology: v6e:2x2x1
jax: 0.10.0
libtpu: 0.0.40
codegen_flags: <defaults>
</compile_context>

<pallas_src>
import functools

import jax
import jax.numpy as jnp
from jax.experimental import pallas as pl
from jax.experimental.pallas import tpu as pltpu


# ----------------------------- activations ----------------------------------
def _relu6(x):
    return jnp.minimum(jnp.maximum(x, 0.0), 6.0)


def _hardswish(x):
    return x * _relu6(x + 3.0) * (1.0 / 6.0)


def _act(x, activate):
    return _relu6(x) if activate == "relu" else _hardswish(x)


# ------------------------------- kernel --------------------------------------
def _se_ib_kernel(x_ref, masks_ref, pool_sel_ref, gate_sel_ref,
                  w_es_ref, b_es_ref, wd_ref,
                  wfc1_ref, bfc1_ref, wfc2_ref, bfc2_ref,
                  w3_ref, b3_ref,
                  o_ref, *, Cmid, K, H, W, activate, use_se, mxu_dtype):
    """One grid step processes NB images laid out as a (C, L) slab, L = NB*H*W.

    Lane l encodes (image, row, col); channels sit on the sublane axis, so every
    load/store is lane-dense and the 1x1 convs are (Cout, C) @ (C, L) matmuls.
    """
    L = x_ref.shape[-1]
    pad = (K - 1) // 2
    center = (K * K) // 2                                  # dh = dk = 0 tap (K odd)

    x = x_ref[0]                                           # (Cin, L), mxu_dtype

    # ---- fused expand 1x1 (+BN+act) & shortcut 1x1 (+BN): one MXU pass over x
    h_es = (jnp.dot(w_es_ref[...], x, preferred_element_type=jnp.float32)
            + b_es_ref[...])                               # (Cmid+Cout, L) f32
    h1 = _act(h_es[:Cmid], activate)                       # (Cmid, L) expand path
    sc = h_es[Cmid:]                                       # (Cout, L) shortcut (no act)

    # ---- depthwise KxK conv, stride 1: XLU lane rolls + precomputed edge masks
    # wd_ref[kk] is the folded per-channel tap weight (Cmid, 1), wd_ref[K*K] the
    # folded bias.  masks_ref[kk] is a (1, L) 0/1 mask zeroing every lane whose
    # tap would cross an image edge (which also covers every circular wrap).
    acc = h1 * wd_ref[center] + wd_ref[K * K]              # centre tap: no roll/mask
    for kk in range(K * K):                                # static unroll, K small
        if kk == center:
            continue
        kh, kw = divmod(kk, K)
        d = (kh - pad) * W + (kw - pad)                    # lane shift of this tap
        tap = pltpu.roll(h1, (-d) % L, 1)                  # tap[:, l] == h1[:, l + d]
        acc = acc + (tap * masks_ref[kk]) * wd_ref[kk]
    dw = _act(acc, activate)                               # (Cmid, L) f32

    # ---- Squeeze-and-Excite (per-image global average pool) on the MXU -------
    if use_se:
        inv_hw = 1.0 / (H * W)
        pooled = jnp.dot(dw.astype(mxu_dtype), pool_sel_ref[...],
                         preferred_element_type=jnp.float32) * inv_hw   # (Cmid, NB)
        z = _relu6(jnp.dot(wfc1_ref[...], pooled.astype(mxu_dtype),
                           preferred_element_type=jnp.float32) + bfc1_ref[...])
        s = _hardswish(jnp.dot(wfc2_ref[...], z.astype(mxu_dtype),
                               preferred_element_type=jnp.float32) + bfc2_ref[...])
        gate = jnp.dot(s.astype(mxu_dtype), gate_sel_ref[...],          # (Cmid, L)
                       preferred_element_type=jnp.float32)
        dw = dw * gate

    # ---- 1x1 project conv (+BN) + activation, then add shortcut --------------
    y = jnp.dot(w3_ref[...], dw.astype(mxu_dtype),
                preferred_element_type=jnp.float32) + b3_ref[...]
    y = _act(y, activate) + sc                             # (Cout, L) f32

    o_ref[0] = y.astype(o_ref.dtype)                       # lane-dense, unmasked store


# ------------------------------ block sizing ---------------------------------
_DEF_VMEM_BUDGET = 24 * 1024 * 1024     # per-step working-set target (fits v7x 64 MiB)
_DEF_VMEM_LIMIT = 48 * 1024 * 1024      # scoped VMEM the compiler may use


def _block_vmem_bytes(nb, HW, Cin, Cmid, Cout, KK, use_se, act_bytes, out_bytes):
    """Rough per-grid-step VMEM working set (tile-padded, double-buffered I/O)."""
    L = nb * HW
    b = 2 * Cin * L * act_bytes                   # input slab (double-buffered)
    b += 2 * Cout * L * out_bytes                 # output slab (double-buffered)
    b += 2 * KK * 8 * L * 4                       # (K*K, 1, L) f32 edge masks
    if use_se:
        b += 2 * (128 + 16) * L * act_bytes       # (L,NB)+(NB,L) selectors (tile pad)
    b += 6 * Cmid * L * 4                         # live f32 intermediates in-kernel
    return b


def _choose_nb(N, HW, fits):
    """Largest divisor NB of N whose per-step working set fits the VMEM budget,
    preferring a 128-aligned lane axis, and keeping >=2 batch chunks (so v7x's
    two TensorCores both get work) whenever that still leaves >=512 lanes."""
    divs = [d for d in range(1, N + 1) if N % d == 0]
    ok = [d for d in divs if fits(d)] or [1]
    # TODO(synk): when no divisor is 128-aligned the final store degrades to a
    # masked partial vst; pad the batch instead of falling back.
    aligned = [d for d in ok if (d * HW) % 128 == 0] or ok
    nb = max(aligned)
    two_chunk = [d for d in aligned if N // d >= 2 and d * HW >= 512]
    if two_chunk:
        nb = max(two_chunk)
    return nb


# ------------------------------ wrappers --------------------------------------
def se_inverted_bottleneck_lane_dense(x_cl, params, *, H, W, NB, kernel_size,
                                      activate, use_se, mxu_dtype=jnp.bfloat16,
                                      out_dtype=jnp.float32,
                                      vmem_limit_bytes=_DEF_VMEM_LIMIT):
    """Core call on lane-dense activations.

    x_cl: (G, Cin, L) with L = NB*H*W; lane l of chunk g holds pixel
    (image = l // (H*W), row, col).  Returns (G, Cout, L) in out_dtype.
    Keep consecutive bottleneck blocks in this layout and convert NCHW only at
    network entry/exit — the per-block transposes cost as much HBM traffic as
    the kernel itself at this arithmetic intensity.
    """
    (w1, b1, wd, bd, wfc1, bfc1, wfc2, bfc2, w3, b3, wsc, bsc) = params
    G, Cin, L = x_cl.shape
    K = kernel_size
    Cmid, Cout = w1.shape[0], w3.shape[0]
    HW = H * W
    assert K % 2 == 1, "odd kernel_size only (MobileNetV3 uses 3/5)"
    assert L == NB * HW
    x_cl = x_cl.astype(mxu_dtype)

    # ---- grid-invariant lane bookkeeping, computed once outside the kernel ---
    pos = jnp.arange(L, dtype=jnp.int32) % HW
    hh, ww = pos // W, pos % W
    pad = (K - 1) // 2
    mask_rows = []
    for kk in range(K * K):
        kh, kw = divmod(kk, K)
        dh, dk = kh - pad, kw - pad
        mask_rows.append((hh + dh >= 0) & (hh + dh < H) &
                         (ww + dk >= 0) & (ww + dk < W))
    masks = jnp.stack(mask_rows).astype(jnp.float32).reshape(K * K, 1, L)

    if use_se:
        img = jnp.arange(L, dtype=jnp.int32) // HW
        gate_sel = (jnp.arange(NB, dtype=jnp.int32)[:, None] == img[None, :])
        gate_sel = gate_sel.astype(mxu_dtype)              # (NB, L) one-hot
        pool_sel = gate_sel.T                              # (L, NB) one-hot
    else:
        gate_sel = jnp.zeros((8, 128), mxu_dtype)          # unused dummies
        pool_sel = jnp.zeros((8, 128), mxu_dtype)

    # ---- parameter packing: fused expand+shortcut, depthwise taps+bias merged
    w_es = jnp.concatenate([w1, wsc], axis=0).astype(mxu_dtype)   # (Cmid+Cout, Cin)
    b_es = jnp.concatenate([b1, bsc], axis=0)                     # (Cmid+Cout, 1)
    wd_all = jnp.concatenate([wd, bd[None]], axis=0)              # (K*K+1, Cmid, 1)
    consts = (masks, pool_sel, gate_sel, w_es, b_es, wd_all,
              wfc1.astype(mxu_dtype), bfc1, wfc2.astype(mxu_dtype), bfc2,
              w3.astype(mxu_dtype), b3)

    kernel = functools.partial(_se_ib_kernel, Cmid=Cmid, K=K, H=H, W=W,
                               activate=activate, use_se=use_se,
                               mxu_dtype=mxu_dtype)

    def full_spec(a):  # grid-invariant input: same whole-array block every step
        nd = a.ndim
        return pl.BlockSpec(a.shape, lambda g, _nd=nd: (0,) * _nd)
    # TODO(synk): single-buffer the constant inputs once their VMEM matters;
    # the pipeline already skips re-copying unchanged blocks.

    return pl.pallas_call(
        kernel,
        out_shape=jax.ShapeDtypeStruct((G, Cout, L), out_dtype),
        grid=(G,),
        in_specs=[pl.BlockSpec((1, Cin, L), lambda g: (g, 0, 0))]
                 + [full_spec(c) for c in consts],
        out_specs=pl.BlockSpec((1, Cout, L), lambda g: (g, 0, 0)),
        compiler_params=pltpu.CompilerParams(
            dimension_semantics=("parallel",),      # batch chunks shard across TCs
            vmem_limit_bytes=vmem_limit_bytes),
    )(x_cl, *consts)


def se_inverted_bottleneck(x_nchw, params, *, kernel_size, stride, activate,
                           use_se, mxu_dtype=jnp.bfloat16, out_dtype=jnp.float32,
                           vmem_budget_bytes=_DEF_VMEM_BUDGET,
                           vmem_limit_bytes=_DEF_VMEM_LIMIT):
    """NCHW convenience wrapper (layout converted at entry/exit)."""
    assert stride == 1, "only stride==1 implemented (see TODO)"
    N, Cin, H, W = x_nchw.shape
    Cmid, Cout = params[0].shape[0], params[8].shape[0]
    HW, KK = H * W, kernel_size * kernel_size
    act_bytes = jnp.finfo(mxu_dtype).bits // 8
    out_bytes = jnp.finfo(out_dtype).bits // 8
    fits = lambda nb: _block_vmem_bytes(nb, HW, Cin, Cmid, Cout, KK, use_se,
                                        act_bytes, out_bytes) <= vmem_budget_bytes
    NB = _choose_nb(N, HW, fits)
    G, L = N // NB, NB * HW

    # NCHW -> (batch chunk, C, NB*H*W): channels on sublanes, pixels on lanes.
    # Cast straight to bf16 so the layout transpose moves half the bytes.
    x_cl = (x_nchw.astype(mxu_dtype)
            .reshape(G, NB, Cin, HW).transpose(0, 2, 1, 3).reshape(G, Cin, L))

    out = se_inverted_bottleneck_lane_dense(
        x_cl, params, H=H, W=W, NB=NB, kernel_size=kernel_size,
        activate=activate, use_se=use_se, mxu_dtype=mxu_dtype,
        out_dtype=out_dtype, vmem_limit_bytes=vmem_limit_bytes)

    return (out.reshape(G, Cout, NB, H, W).transpose(0, 2, 1, 3, 4)
            .reshape(N, Cout, H, W))


# ----------------------- deterministic parameter init ------------------------
def _fold_bn(w_oc_first, b, gamma, beta, mean, var, eps=1e-5):
    """Fold eval-mode BatchNorm into the preceding conv (out-channel = axis 0)."""
    scale = gamma / jnp.sqrt(var + eps)
    shape = (-1,) + (1,) * (w_oc_first.ndim - 1)
    return w_oc_first * scale.reshape(shape), (b - mean) * scale + beta


def init_params(key, Cin, Cmid, Cout, K, divide=4):
    ks = iter(jax.random.split(key, 32))

    def nrm(shape, s=0.3):
        return s * jax.random.normal(next(ks), shape, jnp.float32)

    def bn(c):
        gamma = 1.0 + 0.1 * jax.random.normal(next(ks), (c,), jnp.float32)
        beta = 0.1 * jax.random.normal(next(ks), (c,), jnp.float32)
        mean = 0.1 * jax.random.normal(next(ks), (c,), jnp.float32)
        var = jnp.abs(1.0 + 0.1 * jax.random.normal(next(ks), (c,), jnp.float32))
        return gamma, beta, mean, var

    w1, b1 = _fold_bn(nrm((Cmid, Cin)), nrm((Cmid,), 0.1), *bn(Cmid))        # expand 1x1
    wd, bd = _fold_bn(nrm((Cmid, K, K)), nrm((Cmid,), 0.1), *bn(Cmid))       # depthwise KxK
    mid_se = Cmid // divide
    wfc1, bfc1 = nrm((mid_se, Cmid)), nrm((mid_se,), 0.1)                    # SE fc1
    wfc2, bfc2 = nrm((Cmid, mid_se)), nrm((Cmid,), 0.1)                      # SE fc2
    w3, b3 = _fold_bn(nrm((Cout, Cmid)), nrm((Cout,), 0.1), *bn(Cout))       # project 1x1
    wsc, bsc = _fold_bn(nrm((Cout, Cin)), nrm((Cout,), 0.1), *bn(Cout))      # shortcut 1x1

    wd_k = jnp.transpose(wd, (1, 2, 0)).reshape(K * K, Cmid, 1)              # tap-major
    col = lambda v: v.reshape(-1, 1)
    return (w1, col(b1), wd_k, col(bd), wfc1, col(bfc1), wfc2, col(bfc2),
            w3, col(b3), wsc, col(bsc))


# --------------------------- pure-JAX reference ------------------------------
def reference(x_nchw, params, *, kernel_size, stride, activate, use_se,
              matmul_dtype=jnp.float32):
    """NCHW reference. matmul_dtype=bfloat16 reproduces the kernel's MXU-operand
    quantization (incl. SE pooling over bf16(dw) and a bf16 gate) for a tight
    comparison; float32 is the true f32 module (einsums at HIGHEST precision)."""
    (w1, b1, wd, bd, wfc1, bfc1, wfc2, bfc2, w3, b3, wsc, bsc) = params
    x = x_nchw.astype(jnp.float32)
    N, Cin, H, W = x.shape
    K = kernel_size
    p = (K - 1) // 2

    if matmul_dtype == jnp.float32:
        cast = lambda a: a
        mm_kw = dict(precision=jax.lax.Precision.HIGHEST)
    else:
        cast = lambda a: a.astype(matmul_dtype)
        mm_kw = dict(preferred_element_type=jnp.float32)

    def conv1x1(w, inp):
        return jnp.einsum("oc,nchw->nohw", cast(w), cast(inp), **mm_kw)

    h1 = _act(conv1x1(w1, x) + b1.reshape(1, -1, 1, 1), activate)
    hp = jnp.pad(h1, ((0, 0), (0, 0), (p, p), (p, p)))
    acc = jnp.zeros_like(h1)
    for kk in range(K * K):
        kh, kw = divmod(kk, K)
        acc = acc + hp[:, :, kh:kh + H, kw:kw + W] * wd[kk].reshape(1, -1, 1, 1)
    dwv = _act(acc + bd.reshape(1, -1, 1, 1), activate)
    if use_se:
        # Pool/gate use the same operand quantization as the kernel's MXU path.
        pooled = cast(dwv).astype(jnp.float32).mean(axis=(2, 3))             # (N, Cmid)
        z = _relu6(jnp.einsum("mc,nc->nm", cast(wfc1), cast(pooled), **mm_kw)
                   + bfc1.reshape(1, -1))
        s = _hardswish(jnp.einsum("cm,nm->nc", cast(wfc2), cast(z), **mm_kw)
                       + bfc2.reshape(1, -1))
        dwv = dwv * cast(s).astype(jnp.float32)[:, :, None, None]
    y = _act(conv1x1(w3, dwv) + b3.reshape(1, -1, 1, 1), activate)
    if stride == 1:
        y = y + conv1x1(wsc, x) + bsc.reshape(1, -1, 1, 1)
    return y


# --------------------------------- main ---------------------------------------
if __name__ == "__main__":
    key = jax.random.PRNGKey(0)
    kx, kp = jax.random.split(key)

    # SEInvertedBottleneck(in_channels=8, mid_channels=16, out_channels=8,
    #                      kernel_size=3, stride=1, activate='hswish',
    #                      use_se=True, se_kernel_size=16)  (se_kernel_size == H == W)
    N, Cin, H, W = 4, 8, 16, 16
    Cmid, Cout, K = 16, 8, 3
    stride, activate, use_se = 1, "hswish", True

    x = jax.random.normal(kx, (N, Cin, H, W), jnp.float32)
    params = init_params(kp, Cin, Cmid, Cout, K)

    out = se_inverted_bottleneck(x, params, kernel_size=K, stride=stride,
                                 activate=activate, use_se=use_se)
    out = jax.block_until_ready(out)
    assert out.shape == (N, Cout, H, W), out.shape
    out = jnp.asarray(out, jnp.float32)

    # Tight check vs a reference applying the SAME bf16 MXU-operand quantization
    # (residual = f32 accumulation order + rare 1-ulp re-quantization, ~1e-5).
    ref_q = reference(x, params, kernel_size=K, stride=stride, activate=activate,
                      use_se=use_se, matmul_dtype=jnp.bfloat16)
    if not jnp.allclose(out, ref_q, atol=2e-3, rtol=2e-3):
        err = float(jnp.max(jnp.abs(out - ref_q)))
        raise AssertionError(f"kernel vs bf16-matched reference mismatch, max|err|={err}")

    # Sanity check vs the true f32 module; tolerance reflects bf16 operand
    # rounding (~2^-9 relative per matmul stage) through the matmul chain.
    ref_f = reference(x, params, kernel_size=K, stride=stride, activate=activate,
                      use_se=use_se, matmul_dtype=jnp.float32)
    if not jnp.allclose(out, ref_f, atol=5e-2, rtol=5e-2):
        err = float(jnp.max(jnp.abs(out - ref_f)))
        raise AssertionError(f"kernel vs f32 reference mismatch, max|err|={err}")

    print("KERNEL_OK")
</pallas_src>

<mosaic_0001>
module attributes {stable_mosaic.version = 11 : i64} {
  func.func @_se_ib_kernel(%arg0: i32, %arg1: memref<1x8x512xbf16, #tpu.memory_space<vmem>>, %arg2: memref<9x1x512xf32, #tpu.memory_space<vmem>>, %arg3: memref<512x2xbf16, #tpu.memory_space<vmem>>, %arg4: memref<2x512xbf16, #tpu.memory_space<vmem>>, %arg5: memref<24x8xbf16, #tpu.memory_space<vmem>>, %arg6: memref<24x1xf32, #tpu.memory_space<vmem>>, %arg7: memref<10x16x1xf32, #tpu.memory_space<vmem>>, %arg8: memref<4x16xbf16, #tpu.memory_space<vmem>>, %arg9: memref<4x1xf32, #tpu.memory_space<vmem>>, %arg10: memref<16x4xbf16, #tpu.memory_space<vmem>>, %arg11: memref<16x1xf32, #tpu.memory_space<vmem>>, %arg12: memref<8x16xbf16, #tpu.memory_space<vmem>>, %arg13: memref<8x1xf32, #tpu.memory_space<vmem>>, %arg14: memref<1x8x512xf32, #tpu.memory_space<vmem>>) attributes {dimension_semantics = [#tpu.dimension_semantics<parallel>], iteration_bounds = array<i64: 2>, scalar_prefetch = 0 : i64, scratch_operands = 0 : i64, tpu.core_type = #tpu.core_type<tc>, window_params = [{transform_indices = @transform_0, window_bounds = array<i64: 1, 8, 512>}, {pipeline_mode = #tpu.pipeline_mode<synchronous>, transform_indices = @transform_1, window_bounds = array<i64: 9, 1, 512>}, {pipeline_mode = #tpu.pipeline_mode<synchronous>, transform_indices = @transform_2, window_bounds = array<i64: 512, 2>}, {pipeline_mode = #tpu.pipeline_mode<synchronous>, transform_indices = @transform_3, window_bounds = array<i64: 2, 512>}, {pipeline_mode = #tpu.pipeline_mode<synchronous>, transform_indices = @transform_4, window_bounds = array<i64: 24, 8>}, {pipeline_mode = #tpu.pipeline_mode<synchronous>, transform_indices = @transform_5, window_bounds = array<i64: 24, 1>}, {pipeline_mode = #tpu.pipeline_mode<synchronous>, transform_indices = @transform_6, window_bounds = array<i64: 10, 16, 1>}, {pipeline_mode = #tpu.pipeline_mode<synchronous>, transform_indices = @transform_7, window_bounds = array<i64: 4, 16>}, {pipeline_mode = #tpu.pipeline_mode<synchronous>, transform_indices = @transform_8, window_bounds = array<i64: 4, 1>}, {pipeline_mode = #tpu.pipeline_mode<synchronous>, transform_indices = @transform_9, window_bounds = array<i64: 16, 4>}, {pipeline_mode = #tpu.pipeline_mode<synchronous>, transform_indices = @transform_10, window_bounds = array<i64: 16, 1>}, {pipeline_mode = #tpu.pipeline_mode<synchronous>, transform_indices = @transform_11, window_bounds = array<i64: 8, 16>}, {pipeline_mode = #tpu.pipeline_mode<synchronous>, transform_indices = @transform_12, window_bounds = array<i64: 8, 1>}, {transform_indices = @transform_13, window_bounds = array<i64: 1, 8, 512>}]} {
    %c0 = arith.constant 0 : index
    %c0_0 = arith.constant 0 : index
    %c0_1 = arith.constant 0 : index
    %0 = vector.load %arg1[%c0, %c0_0, %c0_1] : memref<1x8x512xbf16, #tpu.memory_space<vmem>>, vector<1x8x512xbf16>
    %1 = vector.shape_cast %0 : vector<1x8x512xbf16> to vector<8x512xbf16>
    %c0_2 = arith.constant 0 : index
    %c0_3 = arith.constant 0 : index
    %2 = vector.load %arg5[%c0_2, %c0_3] : memref<24x8xbf16, #tpu.memory_space<vmem>>, vector<24x8xbf16>
    %cst = arith.constant dense<0.000000e+00> : vector<24x512xf32>
    %3 = tpu.matmul %2, %1, %cst {dimension_numbers = #tpu.dot_dimension_numbers<[1], [0], [0], [1], [0, 0, 1, 1], [], []>} : vector<24x8xbf16>, vector<8x512xbf16>, vector<24x512xf32> -> vector<24x512xf32>
    %c0_4 = arith.constant 0 : index
    %c0_5 = arith.constant 0 : index
    %4 = vector.load %arg6[%c0_4, %c0_5] : memref<24x1xf32, #tpu.memory_space<vmem>>, vector<24x1xf32>
    %5 = vector.broadcast %4 : vector<24x1xf32> to vector<24x512xf32>
    %6 = arith.addf %3, %5 : vector<24x512xf32>
    %7 = vector.extract_strided_slice %6 {offsets = [0, 0], sizes = [16, 512], strides = [1, 1]} : vector<24x512xf32> to vector<16x512xf32>
    %cst_6 = arith.constant 3.000000e+00 : f32
    %8 = vector.broadcast %cst_6 : f32 to vector<16x512xf32>
    %9 = arith.addf %7, %8 : vector<16x512xf32>
    %cst_7 = arith.constant 0.000000e+00 : f32
    %10 = vector.broadcast %cst_7 : f32 to vector<16x512xf32>
    %11 = arith.maximumf %9, %10 : vector<16x512xf32>
    %cst_8 = arith.constant 6.000000e+00 : f32
    %12 = vector.broadcast %cst_8 : f32 to vector<16x512xf32>
    %13 = arith.minimumf %11, %12 : vector<16x512xf32>
    %14 = arith.mulf %7, %13 : vector<16x512xf32>
    %cst_9 = arith.constant 0.166666672 : f32
    %15 = vector.broadcast %cst_9 : f32 to vector<16x512xf32>
    %16 = arith.mulf %14, %15 : vector<16x512xf32>
    %17 = vector.extract_strided_slice %6 {offsets = [16, 0], sizes = [8, 512], strides = [1, 1]} : vector<24x512xf32> to vector<8x512xf32>
    %c4 = arith.constant 4 : index
    %c0_10 = arith.constant 0 : index
    %c0_11 = arith.constant 0 : index
    %18 = vector.load %arg7[%c4, %c0_10, %c0_11] : memref<10x16x1xf32, #tpu.memory_space<vmem>>, vector<1x16x1xf32>
    %19 = vector.shape_cast %18 : vector<1x16x1xf32> to vector<16x1xf32>
    %20 = vector.broadcast %19 : vector<16x1xf32> to vector<16x512xf32>
    %21 = arith.mulf %16, %20 : vector<16x512xf32>
    %c9 = arith.constant 9 : index
    %c0_12 = arith.constant 0 : index
    %c0_13 = arith.constant 0 : index
    %22 = vector.load %arg7[%c9, %c0_12, %c0_13] : memref<10x16x1xf32, #tpu.memory_space<vmem>>, vector<1x16x1xf32>
    %23 = vector.shape_cast %22 : vector<1x16x1xf32> to vector<16x1xf32>
    %24 = vector.broadcast %23 : vector<16x1xf32> to vector<16x512xf32>
    %25 = arith.addf %21, %24 : vector<16x512xf32>
    %c17_i32 = arith.constant 17 : i32
    %26 = tpu.dynamic_rotate %16 by %c17_i32 dim 1 : vector<16x512xf32>, i32 -> vector<16x512xf32>
    %c0_14 = arith.constant 0 : index
    %c0_15 = arith.constant 0 : index
    %c0_16 = arith.constant 0 : index
    %27 = vector.load %arg2[%c0_14, %c0_15, %c0_16] : memref<9x1x512xf32, #tpu.memory_space<vmem>>, vector<1x1x512xf32>
    %28 = vector.shape_cast %27 : vector<1x1x512xf32> to vector<1x512xf32>
    %29 = vector.broadcast %28 : vector<1x512xf32> to vector<16x512xf32>
    %30 = arith.mulf %26, %29 : vector<16x512xf32>
    %c0_17 = arith.constant 0 : index
    %c0_18 = arith.constant 0 : index
    %c0_19 = arith.constant 0 : index
    %31 = vector.load %arg7[%c0_17, %c0_18, %c0_19] : memref<10x16x1xf32, #tpu.memory_space<vmem>>, vector<1x16x1xf32>
    %32 = vector.shape_cast %31 : vector<1x16x1xf32> to vector<16x1xf32>
    %33 = vector.broadcast %32 : vector<16x1xf32> to vector<16x512xf32>
    %34 = arith.mulf %30, %33 : vector<16x512xf32>
    %35 = arith.addf %25, %34 : vector<16x512xf32>
    %c16_i32 = arith.constant 16 : i32
    %36 = tpu.dynamic_rotate %16 by %c16_i32 dim 1 : vector<16x512xf32>, i32 -> vector<16x512xf32>
    %c1 = arith.constant 1 : index
    %c0_20 = arith.constant 0 : index
    %c0_21 = arith.constant 0 : index
    %37 = vector.load %arg2[%c1, %c0_20, %c0_21] : memref<9x1x512xf32, #tpu.memory_space<vmem>>, vector<1x1x512xf32>
    %38 = vector.shape_cast %37 : vector<1x1x512xf32> to vector<1x512xf32>
    %39 = vector.broadcast %38 : vector<1x512xf32> to vector<16x512xf32>
    %40 = arith.mulf %36, %39 : vector<16x512xf32>
    %c1_22 = arith.constant 1 : index
    %c0_23 = arith.constant 0 : index
    %c0_24 = arith.constant 0 : index
    %41 = vector.load %arg7[%c1_22, %c0_23, %c0_24] : memref<10x16x1xf32, #tpu.memory_space<vmem>>, vector<1x16x1xf32>
    %42 = vector.shape_cast %41 : vector<1x16x1xf32> to vector<16x1xf32>
    %43 = vector.broadcast %42 : vector<16x1xf32> to vector<16x512xf32>
    %44 = arith.mulf %40, %43 : vector<16x512xf32>
    %45 = arith.addf %35, %44 : vector<16x512xf32>
    %c15_i32 = arith.constant 15 : i32
    %46 = tpu.dynamic_rotate %16 by %c15_i32 dim 1 : vector<16x512xf32>, i32 -> vector<16x512xf32>
    %c2 = arith.constant 2 : index
    %c0_25 = arith.constant 0 : index
    %c0_26 = arith.constant 0 : index
    %47 = vector.load %arg2[%c2, %c0_25, %c0_26] : memref<9x1x512xf32, #tpu.memory_space<vmem>>, vector<1x1x512xf32>
    %48 = vector.shape_cast %47 : vector<1x1x512xf32> to vector<1x512xf32>
    %49 = vector.broadcast %48 : vector<1x512xf32> to vector<16x512xf32>
    %50 = arith.mulf %46, %49 : vector<16x512xf32>
    %c2_27 = arith.constant 2 : index
    %c0_28 = arith.constant 0 : index
    %c0_29 = arith.constant 0 : index
    %51 = vector.load %arg7[%c2_27, %c0_28, %c0_29] : memref<10x16x1xf32, #tpu.memory_space<vmem>>, vector<1x16x1xf32>
    %52 = vector.shape_cast %51 : vector<1x16x1xf32> to vector<16x1xf32>
    %53 = vector.broadcast %52 : vector<16x1xf32> to vector<16x512xf32>
    %54 = arith.mulf %50, %53 : vector<16x512xf32>
    %55 = arith.addf %45, %54 : vector<16x512xf32>
    %c1_i32 = arith.constant 1 : i32
    %56 = tpu.dynamic_rotate %16 by %c1_i32 dim 1 : vector<16x512xf32>, i32 -> vector<16x512xf32>
    %c3 = arith.constant 3 : index
    %c0_30 = arith.constant 0 : index
    %c0_31 = arith.constant 0 : index
    %57 = vector.load %arg2[%c3, %c0_30, %c0_31] : memref<9x1x512xf32, #tpu.memory_space<vmem>>, vector<1x1x512xf32>
    %58 = vector.shape_cast %57 : vector<1x1x512xf32> to vector<1x512xf32>
    %59 = vector.broadcast %58 : vector<1x512xf32> to vector<16x512xf32>
    %60 = arith.mulf %56, %59 : vector<16x512xf32>
    %c3_32 = arith.constant 3 : index
    %c0_33 = arith.constant 0 : index
    %c0_34 = arith.constant 0 : index
    %61 = vector.load %arg7[%c3_32, %c0_33, %c0_34] : memref<10x16x1xf32, #tpu.memory_space<vmem>>, vector<1x16x1xf32>
    %62 = vector.shape_cast %61 : vector<1x16x1xf32> to vector<16x1xf32>
    %63 = vector.broadcast %62 : vector<16x1xf32> to vector<16x512xf32>
    %64 = arith.mulf %60, %63 : vector<16x512xf32>
    %65 = arith.addf %55, %64 : vector<16x512xf32>
    %c511_i32 = arith.constant 511 : i32
    %66 = tpu.dynamic_rotate %16 by %c511_i32 dim 1 : vector<16x512xf32>, i32 -> vector<16x512xf32>
    %c5 = arith.constant 5 : index
    %c0_35 = arith.constant 0 : index
    %c0_36 = arith.constant 0 : index
    %67 = vector.load %arg2[%c5, %c0_35, %c0_36] : memref<9x1x512xf32, #tpu.memory_space<vmem>>, vector<1x1x512xf32>
    %68 = vector.shape_cast %67 : vector<1x1x512xf32> to vector<1x512xf32>
    %69 = vector.broadcast %68 : vector<1x512xf32> to vector<16x512xf32>
    %70 = arith.mulf %66, %69 : vector<16x512xf32>
    %c5_37 = arith.constant 5 : index
    %c0_38 = arith.constant 0 : index
    %c0_39 = arith.constant 0 : index
    %71 = vector.load %arg7[%c5_37, %c0_38, %c0_39] : memref<10x16x1xf32, #tpu.memory_space<vmem>>, vector<1x16x1xf32>
    %72 = vector.shape_cast %71 : vector<1x16x1xf32> to vector<16x1xf32>
    %73 = vector.broadcast %72 : vector<16x1xf32> to vector<16x512xf32>
    %74 = arith.mulf %70, %73 : vector<16x512xf32>
    %75 = arith.addf %65, %74 : vector<16x512xf32>
    %c497_i32 = arith.constant 497 : i32
    %76 = tpu.dynamic_rotate %16 by %c497_i32 dim 1 : vector<16x512xf32>, i32 -> vector<16x512xf32>
    %c6 = arith.constant 6 : index
    %c0_40 = arith.constant 0 : index
    %c0_41 = arith.constant 0 : index
    %77 = vector.load %arg2[%c6, %c0_40, %c0_41] : memref<9x1x512xf32, #tpu.memory_space<vmem>>, vector<1x1x512xf32>
    %78 = vector.shape_cast %77 : vector<1x1x512xf32> to vector<1x512xf32>
    %79 = vector.broadcast %78 : vector<1x512xf32> to vector<16x512xf32>
    %80 = arith.mulf %76, %79 : vector<16x512xf32>
    %c6_42 = arith.constant 6 : index
    %c0_43 = arith.constant 0 : index
    %c0_44 = arith.constant 0 : index
    %81 = vector.load %arg7[%c6_42, %c0_43, %c0_44] : memref<10x16x1xf32, #tpu.memory_space<vmem>>, vector<1x16x1xf32>
    %82 = vector.shape_cast %81 : vector<1x16x1xf32> to vector<16x1xf32>
    %83 = vector.broadcast %82 : vector<16x1xf32> to vector<16x512xf32>
    %84 = arith.mulf %80, %83 : vector<16x512xf32>
    %85 = arith.addf %75, %84 : vector<16x512xf32>
    %c496_i32 = arith.constant 496 : i32
    %86 = tpu.dynamic_rotate %16 by %c496_i32 dim 1 : vector<16x512xf32>, i32 -> vector<16x512xf32>
    %c7 = arith.constant 7 : index
    %c0_45 = arith.constant 0 : index
    %c0_46 = arith.constant 0 : index
    %87 = vector.load %arg2[%c7, %c0_45, %c0_46] : memref<9x1x512xf32, #tpu.memory_space<vmem>>, vector<1x1x512xf32>
    %88 = vector.shape_cast %87 : vector<1x1x512xf32> to vector<1x512xf32>
    %89 = vector.broadcast %88 : vector<1x512xf32> to vector<16x512xf32>
    %90 = arith.mulf %86, %89 : vector<16x512xf32>
    %c7_47 = arith.constant 7 : index
    %c0_48 = arith.constant 0 : index
    %c0_49 = arith.constant 0 : index
    %91 = vector.load %arg7[%c7_47, %c0_48, %c0_49] : memref<10x16x1xf32, #tpu.memory_space<vmem>>, vector<1x16x1xf32>
    %92 = vector.shape_cast %91 : vector<1x16x1xf32> to vector<16x1xf32>
    %93 = vector.broadcast %92 : vector<16x1xf32> to vector<16x512xf32>
    %94 = arith.mulf %90, %93 : vector<16x512xf32>
    %95 = arith.addf %85, %94 : vector<16x512xf32>
    %c495_i32 = arith.constant 495 : i32
    %96 = tpu.dynamic_rotate %16 by %c495_i32 dim 1 : vector<16x512xf32>, i32 -> vector<16x512xf32>
    %c8 = arith.constant 8 : index
    %c0_50 = arith.constant 0 : index
    %c0_51 = arith.constant 0 : index
    %97 = vector.load %arg2[%c8, %c0_50, %c0_51] : memref<9x1x512xf32, #tpu.memory_space<vmem>>, vector<1x1x512xf32>
    %98 = vector.shape_cast %97 : vector<1x1x512xf32> to vector<1x512xf32>
    %99 = vector.broadcast %98 : vector<1x512xf32> to vector<16x512xf32>
    %100 = arith.mulf %96, %99 : vector<16x512xf32>
    %c8_52 = arith.constant 8 : index
    %c0_53 = arith.constant 0 : index
    %c0_54 = arith.constant 0 : index
    %101 = vector.load %arg7[%c8_52, %c0_53, %c0_54] : memref<10x16x1xf32, #tpu.memory_space<vmem>>, vector<1x16x1xf32>
    %102 = vector.shape_cast %101 : vector<1x16x1xf32> to vector<16x1xf32>
    %103 = vector.broadcast %102 : vector<16x1xf32> to vector<16x512xf32>
    %104 = arith.mulf %100, %103 : vector<16x512xf32>
    %105 = arith.addf %95, %104 : vector<16x512xf32>
    %cst_55 = arith.constant 3.000000e+00 : f32
    %106 = vector.broadcast %cst_55 : f32 to vector<16x512xf32>
    %107 = arith.addf %105, %106 : vector<16x512xf32>
    %cst_56 = arith.constant 0.000000e+00 : f32
    %108 = vector.broadcast %cst_56 : f32 to vector<16x512xf32>
    %109 = arith.maximumf %107, %108 : vector<16x512xf32>
    %cst_57 = arith.constant 6.000000e+00 : f32
    %110 = vector.broadcast %cst_57 : f32 to vector<16x512xf32>
    %111 = arith.minimumf %109, %110 : vector<16x512xf32>
    %112 = arith.mulf %105, %111 : vector<16x512xf32>
    %cst_58 = arith.constant 0.166666672 : f32
    %113 = vector.broadcast %cst_58 : f32 to vector<16x512xf32>
    %114 = arith.mulf %112, %113 : vector<16x512xf32>
    %115 = arith.truncf %114 : vector<16x512xf32> to vector<16x512xbf16>
    %c0_59 = arith.constant 0 : index
    %c0_60 = arith.constant 0 : index
    %116 = vector.load %arg3[%c0_59, %c0_60] : memref<512x2xbf16, #tpu.memory_space<vmem>>, vector<512x2xbf16>
    %cst_61 = arith.constant dense<0.000000e+00> : vector<16x2xf32>
    %117 = tpu.matmul %115, %116, %cst_61 {dimension_numbers = #tpu.dot_dimension_numbers<[1], [0], [0], [1], [0, 0, 1, 1], [], []>} : vector<16x512xbf16>, vector<512x2xbf16>, vector<16x2xf32> -> vector<16x2xf32>
    %cst_62 = arith.constant 3.906250e-03 : f32
    %118 = vector.broadcast %cst_62 : f32 to vector<16x2xf32>
    %119 = arith.mulf %117, %118 : vector<16x2xf32>
    %c0_63 = arith.constant 0 : index
    %c0_64 = arith.constant 0 : index
    %120 = vector.load %arg8[%c0_63, %c0_64] : memref<4x16xbf16, #tpu.memory_space<vmem>>, vector<4x16xbf16>
    %121 = arith.truncf %119 : vector<16x2xf32> to vector<16x2xbf16>
    %cst_65 = arith.constant dense<0.000000e+00> : vector<4x2xf32>
    %122 = tpu.matmul %120, %121, %cst_65 {dimension_numbers = #tpu.dot_dimension_numbers<[1], [0], [0], [1], [0, 0, 1, 1], [], []>} : vector<4x16xbf16>, vector<16x2xbf16>, vector<4x2xf32> -> vector<4x2xf32>
    %c0_66 = arith.constant 0 : index
    %c0_67 = arith.constant 0 : index
    %123 = vector.load %arg9[%c0_66, %c0_67] : memref<4x1xf32, #tpu.memory_space<vmem>>, vector<4x1xf32>
    %124 = vector.broadcast %123 : vector<4x1xf32> to vector<4x2xf32>
    %125 = arith.addf %122, %124 : vector<4x2xf32>
    %cst_68 = arith.constant 0.000000e+00 : f32
    %126 = vector.broadcast %cst_68 : f32 to vector<4x2xf32>
    %127 = arith.maximumf %125, %126 : vector<4x2xf32>
    %cst_69 = arith.constant 6.000000e+00 : f32
    %128 = vector.broadcast %cst_69 : f32 to vector<4x2xf32>
    %129 = arith.minimumf %127, %128 : vector<4x2xf32>
    %c0_70 = arith.constant 0 : index
    %c0_71 = arith.constant 0 : index
    %130 = vector.load %arg10[%c0_70, %c0_71] : memref<16x4xbf16, #tpu.memory_space<vmem>>, vector<16x4xbf16>
    %131 = arith.truncf %129 : vector<4x2xf32> to vector<4x2xbf16>
    %cst_72 = arith.constant dense<0.000000e+00> : vector<16x2xf32>
    %132 = tpu.matmul %130, %131, %cst_72 {dimension_numbers = #tpu.dot_dimension_numbers<[1], [0], [0], [1], [0, 0, 1, 1], [], []>} : vector<16x4xbf16>, vector<4x2xbf16>, vector<16x2xf32> -> vector<16x2xf32>
    %c0_73 = arith.constant 0 : index
    %c0_74 = arith.constant 0 : index
    %133 = vector.load %arg11[%c0_73, %c0_74] : memref<16x1xf32, #tpu.memory_space<vmem>>, vector<16x1xf32>
    %134 = vector.broadcast %133 : vector<16x1xf32> to vector<16x2xf32>
    %135 = arith.addf %132, %134 : vector<16x2xf32>
    %cst_75 = arith.constant 3.000000e+00 : f32
    %136 = vector.broadcast %cst_75 : f32 to vector<16x2xf32>
    %137 = arith.addf %135, %136 : vector<16x2xf32>
    %cst_76 = arith.constant 0.000000e+00 : f32
    %138 = vector.broadcast %cst_76 : f32 to vector<16x2xf32>
    %139 = arith.maximumf %137, %138 : vector<16x2xf32>
    %cst_77 = arith.constant 6.000000e+00 : f32
    %140 = vector.broadcast %cst_77 : f32 to vector<16x2xf32>
    %141 = arith.minimumf %139, %140 : vector<16x2xf32>
    %142 = arith.mulf %135, %141 : vector<16x2xf32>
    %cst_78 = arith.constant 0.166666672 : f32
    %143 = vector.broadcast %cst_78 : f32 to vector<16x2xf32>
    %144 = arith.mulf %142, %143 : vector<16x2xf32>
    %145 = arith.truncf %144 : vector<16x2xf32> to vector<16x2xbf16>
    %c0_79 = arith.constant 0 : index
    %c0_80 = arith.constant 0 : index
    %146 = vector.load %arg4[%c0_79, %c0_80] : memref<2x512xbf16, #tpu.memory_space<vmem>>, vector<2x512xbf16>
    %cst_81 = arith.constant dense<0.000000e+00> : vector<16x512xf32>
    %147 = tpu.matmul %145, %146, %cst_81 {dimension_numbers = #tpu.dot_dimension_numbers<[1], [0], [0], [1], [0, 0, 1, 1], [], []>} : vector<16x2xbf16>, vector<2x512xbf16>, vector<16x512xf32> -> vector<16x512xf32>
    %148 = arith.mulf %114, %147 : vector<16x512xf32>
    %c0_82 = arith.constant 0 : index
    %c0_83 = arith.constant 0 : index
    %149 = vector.load %arg12[%c0_82, %c0_83] : memref<8x16xbf16, #tpu.memory_space<vmem>>, vector<8x16xbf16>
    %150 = arith.truncf %148 : vector<16x512xf32> to vector<16x512xbf16>
    %cst_84 = arith.constant dense<0.000000e+00> : vector<8x512xf32>
    %151 = tpu.matmul %149, %150, %cst_84 {dimension_numbers = #tpu.dot_dimension_numbers<[1], [0], [0], [1], [0, 0, 1, 1], [], []>} : vector<8x16xbf16>, vector<16x512xbf16>, vector<8x512xf32> -> vector<8x512xf32>
    %c0_85 = arith.constant 0 : index
    %c0_86 = arith.constant 0 : index
    %152 = vector.load %arg13[%c0_85, %c0_86] : memref<8x1xf32, #tpu.memory_space<vmem>>, vector<8x1xf32>
    %153 = vector.broadcast %152 : vector<8x1xf32> to vector<8x512xf32>
    %154 = arith.addf %151, %153 : vector<8x512xf32>
    %cst_87 = arith.constant 3.000000e+00 : f32
    %155 = vector.broadcast %cst_87 : f32 to vector<8x512xf32>
    %156 = arith.addf %154, %155 : vector<8x512xf32>
    %cst_88 = arith.constant 0.000000e+00 : f32
    %157 = vector.broadcast %cst_88 : f32 to vector<8x512xf32>
    %158 = arith.maximumf %156, %157 : vector<8x512xf32>
    %cst_89 = arith.constant 6.000000e+00 : f32
    %159 = vector.broadcast %cst_89 : f32 to vector<8x512xf32>
    %160 = arith.minimumf %158, %159 : vector<8x512xf32>
    %161 = arith.mulf %154, %160 : vector<8x512xf32>
    %cst_90 = arith.constant 0.166666672 : f32
    %162 = vector.broadcast %cst_90 : f32 to vector<8x512xf32>
    %163 = arith.mulf %161, %162 : vector<8x512xf32>
    %164 = arith.addf %163, %17 : vector<8x512xf32>
    %c0_91 = arith.constant 0 : index
    %c0_92 = arith.constant 0 : index
    %c0_93 = arith.constant 0 : index
    %165 = vector.load %arg14[%c0_91, %c0_92, %c0_93] : memref<1x8x512xf32, #tpu.memory_space<vmem>>, vector<1x8x512xf32>
    %166 = vector.shape_cast %165 : vector<1x8x512xf32> to vector<8x512xf32>
    %167 = vector.shape_cast %164 : vector<8x512xf32> to vector<1x8x512xf32>
    tpu.vector_store %arg14[%c0_91, %c0_92, %c0_93], %167 {strides = array<i32>} : memref<1x8x512xf32, #tpu.memory_space<vmem>>, vector<1x8x512xf32>,
    return
  }
  func.func @transform_0(%arg0: i32) -> (i32, i32, i32) {
    %c0_i32 = arith.constant 0 : i32
    %c0_i32_0 = arith.constant 0 : i32
    %c0_i32_1 = arith.constant 0 : i32
    return %arg0, %c0_i32, %c0_i32_0 : i32, i32, i32
  }
  func.func @transform_1(%arg0: i32) -> (i32, i32, i32) {
    %c0_i32 = arith.constant 0 : i32
    %c0_i32_0 = arith.constant 0 : i32
    %c0_i32_1 = arith.constant 0 : i32
    %c0_i32_2 = arith.constant 0 : i32
    return %c0_i32, %c0_i32_0, %c0_i32_1 : i32, i32, i32
  }
  func.func @transform_2(%arg0: i32) -> (i32, i32) {
    %c0_i32 = arith.constant 0 : i32
    %c0_i32_0 = arith.constant 0 : i32
    %c0_i32_1 = arith.constant 0 : i32
    return %c0_i32, %c0_i32_0 : i32, i32
  }
  func.func @transform_3(%arg0: i32) -> (i32, i32) {
    %c0_i32 = arith.constant 0 : i32
    %c0_i32_0 = arith.constant 0 : i32
    %c0_i32_1 = arith.constant 0 : i32
    return %c0_i32, %c0_i32_0 : i32, i32
  }
  func.func @transform_4(%arg0: i32) -> (i32, i32) {
    %c0_i32 = arith.constant 0 : i32
    %c0_i32_0 = arith.constant 0 : i32
    %c0_i32_1 = arith.constant 0 : i32
    return %c0_i32, %c0_i32_0 : i32, i32
  }
  func.func @transform_5(%arg0: i32) -> (i32, i32) {
    %c0_i32 = arith.constant 0 : i32
    %c0_i32_0 = arith.constant 0 : i32
    %c0_i32_1 = arith.constant 0 : i32
    return %c0_i32, %c0_i32_0 : i32, i32
  }
  func.func @transform_6(%arg0: i32) -> (i32, i32, i32) {
    %c0_i32 = arith.constant 0 : i32
    %c0_i32_0 = arith.constant 0 : i32
    %c0_i32_1 = arith.constant 0 : i32
    %c0_i32_2 = arith.constant 0 : i32
    return %c0_i32, %c0_i32_0, %c0_i32_1 : i32, i32, i32
  }
  func.func @transform_7(%arg0: i32) -> (i32, i32) {
    %c0_i32 = arith.constant 0 : i32
    %c0_i32_0 = arith.constant 0 : i32
    %c0_i32_1 = arith.constant 0 : i32
    return %c0_i32, %c0_i32_0 : i32, i32
  }
  func.func @transform_8(%arg0: i32) -> (i32, i32) {
    %c0_i32 = arith.constant 0 : i32
    %c0_i32_0 = arith.constant 0 : i32
    %c0_i32_1 = arith.constant 0 : i32
    return %c0_i32, %c0_i32_0 : i32, i32
  }
  func.func @transform_9(%arg0: i32) -> (i32, i32) {
    %c0_i32 = arith.constant 0 : i32
    %c0_i32_0 = arith.constant 0 : i32
    %c0_i32_1 = arith.constant 0 : i32
    return %c0_i32, %c0_i32_0 : i32, i32
  }
  func.func @transform_10(%arg0: i32) -> (i32, i32) {
    %c0_i32 = arith.constant 0 : i32
    %c0_i32_0 = arith.constant 0 : i32
    %c0_i32_1 = arith.constant 0 : i32
    return %c0_i32, %c0_i32_0 : i32, i32
  }
  func.func @transform_11(%arg0: i32) -> (i32, i32) {
    %c0_i32 = arith.constant 0 : i32
    %c0_i32_0 = arith.constant 0 : i32
    %c0_i32_1 = arith.constant 0 : i32
    return %c0_i32, %c0_i32_0 : i32, i32
  }
  func.func @transform_12(%arg0: i32) -> (i32, i32) {
    %c0_i32 = arith.constant 0 : i32
    %c0_i32_0 = arith.constant 0 : i32
    %c0_i32_1 = arith.constant 0 : i32
    return %c0_i32, %c0_i32_0 : i32, i32
  }
  func.func @transform_13(%arg0: i32) -> (i32, i32, i32) {
    %c0_i32 = arith.constant 0 : i32
    %c0_i32_0 = arith.constant 0 : i32
    %c0_i32_1 = arith.constant 0 : i32
    return %arg0, %c0_i32, %c0_i32_0 : i32, i32, i32
  }
}

</mosaic_0001>

<bundles_post_ra>
// kernel: tpu_custom_call.1
= control target key start
LH: loop header
LB: loop body
LE: loop exit
PB: predicated region body
PF: predicated region fallthrough
CT: control target
= control target key end

     0   :  { %18 = vsyncpa [#allocation3], 0  ;;  %s3717_s0 = inlined_call_operand.vmem [shape: bf16[2,8,512], index: 0, kind: input, shape index: {}]   ;;  %s3718_s1 = inlined_call_operand.vmem [shape: f32[9,1,512], index: 1, kind: input, shape index: {}]   ;;  %s3719_s2 = inlined_call_operand.vmem [shape: bf16[512,2], index: 2, kind: input, shape index: {}]   ;;  %s3720_s3 = inlined_call_operand.vmem [shape: bf16[2,512], index: 3, kind: input, shape index: {}]   ;;  %s3721_s4 = inlined_call_operand.vmem [shape: bf16[24,8], index: 4, kind: input, shape index: {}]   ;;  %s3722_s5 = inlined_call_operand.vmem [shape: f32[24,1], index: 5, kind: input, shape index: {}]   ;;  %s3723_s6 = inlined_call_operand.vmem [shape: f32[10,16,1], index: 6, kind: input, shape index: {}]   ;;  %s3724_s7 = inlined_call_operand.vmem [shape: bf16[4,16], index: 7, kind: input, shape index: {}]   ;;  %s3725_s8 = inlined_call_operand.vmem [shape: f32[4,1], index: 8, kind: input, shape index: {}]   ;;  %s3726_s9 = inlined_call_operand.vmem [shape: bf16[16,4], index: 9, kind: input, shape index: {}]   ;;  %s3727_s10 = inlined_call_operand.vmem [shape: f32[16,1], index: 10, kind: input, shape index: {}]   ;;  %s3728_s11 = inlined_call_operand.vmem [shape: bf16[8,16], index: 11, kind: input, shape index: {}]   ;;  %s3729_s12 = inlined_call_operand.vmem [shape: f32[8,1], index: 12, kind: input, shape index: {}]   ;;  %s3730_s13 = inlined_call_operand.hbm [shape: f32[2,8,512], index: 13, kind: output, shape index: {}]  }
   0x1   :  { %20 = vsyncpa [#allocation3 + $0x1], 0  ;;  %s2608_s25 = smov 0   ;;  %s2610_s26 = smov 0  }
   0x2   :  { %s2612_s27 = smov 0   ;;  %s2614_s28 = smov 0  }
   0x3 LB: > { %3777 = sst [smem:[#allocation5_spill]] %s2519_s27  ;;  %s2629_s29 = sadd.s32 4294967295, %s2523_s28   ;;  %s2523_s28 = sphi %s2614_s28, %s3870_s28   ;;  %s2519_s27 = sphi %s2612_s27, %s3872_s27   ;;  %s2515_s26 = sphi %s2610_s26, %s3874_s26   ;;  %s2511_s25 = sphi %s2608_s25, %s3873_s25  }
   0x4   : > { %s2218_s30 = sadd.s32 4294967294, %s2523_s28   ;;  %s2633_s14 = sadd.s32 1, %s2523_s28  }
   0x5   : > { %3778 = sst [smem:[#allocation6_spill]] %s2633_s14  ;;  %s311_s15 = sadd.s32 1, %s2519_s27 }
   0x6   : > { %s308_s16 = ssub.s32 %s2523_s28, %s2633_s14  ;;  %p321_p0 = scmp.ne.s32.totalorder %s2519_s27, %s2515_s26 }
   0x7   : > { %p309_p1 = scmp.eq.s32.totalorder %s308_s16, 0  ;;  %p322_p2 = scmp.eq.s32.totalorder %s2629_s29, 1 }
   0x8   : > { %p327_p3 = scmp.ne.s32.totalorder %s2515_s26, %s2511_s25  ;;  %p328_p4 = scmp.eq.s32.totalorder %s2218_s30, 1 }
   0x9   : > { %s2644_s17 = scalar_select %p309_p1, %s2519_s27, %s311_s15  }
   0xa   : > { %p2646_p5 = por %p322_p2, %p321_p0  ;;  %p2650_p6 = por %p328_p4, %p327_p3 }
   0xb   : > { %3779 = sst [smem:[#allocation7_spill]] %s2644_s17  ;;  %p2221_p7 = scmp.ge.s32.totalorder %s2523_s28, 1 }
   0xc   : > { %p390_p8 = scmp.lt.s32.totalorder %s2523_s28, 3 }
   0xe   : > { %p391_p9 = pnand %p2221_p7, %p390_p8 }
  0x10   : > { %394 = sbr.rel (%p391_p9) target bundleno = 1558 (0x616), region = 72 }
  0x15   : > { %p434_p10 = scmp.lt.s32.totalorder %s2629_s29, 1  ;;  %v3736_v0 = vmov 0   ;;  %v445_v1 = vld [vmem:[%s3722_s5] sm:$0xff]  ;;  %v446_v2 = vld [vmem:[%s3722_s5 + $0x8] sm:$0xff]  ;;  %vm488_vm0 = vcmask 1043456   ;;  %v2239_v10 = vld [vmem:[%s3723_s6 + $0x90] sm:$0xff] }
  0x16   : > { %533 = vmatprep.mubr.bf16.mxu0 %v3736_v0  ;;  %584 = vmatprep.mubr.bf16.mxu1 %v3736_v0  ;;  %v2237_v3 = vld [vmem:[%s3723_s6 + $0x40] sm:$0xff]  ;;  %v2238_v11 = vld [vmem:[%s3723_s6 + $0x48] sm:$0xff]  ;;  %vm481_vm1 = vcmask 64512   ;;  %v2240_v16 = vld [vmem:[%s3723_s6 + $0x98] sm:$0xff]  ;;  %s2526_s15 = smov 17   ;;  %s2527_s16 = smov 16  }
  0x17   : > { %s435_s22 = scalar_select %p434_p10, %s2629_s29, 1  ;;  %2422 = vset.pattern.permute.xlu0 %v3736_v0  ;;  %2423 = vset.pattern.permute.xlu1 %v3736_v0  ;;  %v2428_v14 = vld [vmem:[%s3721_s4] sm:$0xff]   ;;  %v2242_v17 = vld [vmem:[%s3723_s6 + $0x10] sm:$0xff]  ;;  %v743_v18 = vld [vmem:[%s3723_s6 + $0x8] sm:$0xff]  ;;  %vm2535_vm10 = vmmov 0   ;;  %vm1757_vm11 = vcmask 130048  }
  0x18   : > { %450 = vperm.xlu0 %2422, %v445_v1   ;;  %648 = vperm.xlu1 %2423, %v2237_v3   ;;  %v742_v15 = vld [vmem:[%s3723_s6] sm:$0xff]  ;;  %v2243_v20 = vld [vmem:[%s3723_s6 + $0x18] sm:$0xff]  ;;  %v2248_v21 = vld [vmem:[%s3723_s6 + $0x30] sm:$0xff]  ;;  %s2528_s20 = smov 15   ;;  %s2529_s21 = smov 1   ;;  %vm1827_vm12 = vcmask 1041408  }
  0x19   : > { %s2309_s23 = sshll.u32 %s435_s22, 4  ;;  %v2245_v19 = vld [vmem:[%s3723_s6 + $0x20] sm:$0xff]  ;;  %v2246_v22 = vld [vmem:[%s3723_s6 + $0x28] sm:$0xff]  ;;  %v2251_v23 = vld [vmem:[%s3723_s6 + $0x50] sm:$0xff]  ;;  %s2530_s22 = smov 127   ;;  %vm1823_vm13 = vcmask 31744  }
  0x1a   : > { %s438_s17 = scalar_lea.vmem %s3717_s0, %s2309_s23  ;;  %v2249_v24 = vld [vmem:[%s3723_s6 + $0x38] sm:$0xff]  ;;  %v2254_v25 = vld [vmem:[%s3723_s6 + $0x60] sm:$0xff]  ;;  %v2257_v27 = vld [vmem:[%s3723_s6 + $0x70] sm:$0xff]  ;;  %s2531_s24 = smov 113   ;;  %vm1913_vm14 = vcmask 1040384   ;;  %vm1909_vm15 = vcmask 15360  }
  0x1b   : > { %v440_v4 = vld [vmem:[%s438_s17] sm:$0xff]  ;;  %v441_v5 = vld [vmem:[%s438_s17 + $0x8] sm:$0xff]  ;;  %v2252_v26 = vld [vmem:[%s3723_s6 + $0x58] sm:$0xff]  ;;  %s2532_s27 = smov 112   ;;  %s3734_s14 = smov 111  }
  0x1c   : > { %v2228_v6 = vcombine.high %v440_v4, %v440_v4  ;;  %v2230_v7 = vcombine.high %v441_v5, %v441_v5  ;;  %v2227_v8 = vcombine.low %v440_v4, %v440_v4  ;;  %v2229_v9 = vcombine.low %v441_v5, %v441_v5  ;;  %455 = vperm.xlu0 %2422, %v446_v2   ;;  %v2255_v28 = vld [vmem:[%s3723_s6 + $0x68] sm:$0xff]  ;;  %v2260_v29 = vld [vmem:[%s3723_s6 + $0x80] sm:$0xff]  ;;  %v2258_v30 = vld [vmem:[%s3723_s6 + $0x78] sm:$0xff]  ;;  %s3791_s17 = smov 111   ;;  %s2310_s23 = sshll.u32 %s2629_s29, 9 }
  0x1d   : > { %653 = vperm.xlu1 %2423, %v2238_v11   ;;  %v2261_v31 = vld [vmem:[%s3723_s6 + $0x88] sm:$0xff] }
  0x1e   : > { %2231 = vmatprep.subr.msk.bf16.mxu0 %vm488_vm0, %v2228_v6  ;;  %2234 = vmatprep.subr.msk.bf16.mxu1 %vm488_vm0, %v2230_v7  ;;  %v490_v12 = vsel %vm488_vm0, %v2227_v8, 0  ;;  %v496_v13 = vsel %vm488_vm0, %v2229_v9, 0  ;;  %v2429_v32 = vld [vmem:[%s3721_s4 + $0x8] ss:$0 sps:$4 sm:$0xff]  }
  0x1f   : > { %516 = vmatpush1.bf16.msra.mxu0 %v490_v12  ;;  %567 = vmatpush1.bf16.msra.mxu1 %v496_v13 }
  0x20   : > { %669 = vperm.xlu0 %2422, %v2239_v10  }
  0x21   : > { %674 = vperm.xlu1 %2423, %v2240_v16  }
  0x22   : > { %2232 = vmatmul.mubr.msk.bf16.vlgmr.msra.gmra.mxu0 %vm481_vm1, %v2428_v14  ;;  %2235 = vmatmul.mubr.msk.bf16.vlgmr.msra.gmra.mxu1 %vm481_vm1, %v2428_v14 }
  0x23   : > { %543 = vmatprep.mubr.bf16.mxu0 %v3736_v0  ;;  %594 = vmatprep.mubr.bf16.mxu1 %v3736_v0 }
  0x24   : > { %746 = vperm.xlu0 %2422, %v742_v15  }
  0x25   : > { %751 = vperm.xlu1 %2423, %v743_v18  }
  0x28   : > { %831 = vperm.xlu0 %2422, %v2242_v17  }
  0x29   : > { %836 = vperm.xlu1 %2423, %v2243_v20  }
  0x2a   : > { %2233 = vmatmul.mubr.msk.bf16.gmra.mxu0 %vm481_vm1, %v2429_v32  ;;  %2236 = vmatmul.mubr.msk.bf16.gmra.mxu1 %vm481_vm1, %v2429_v32 }
  0x2c   : > { %916 = vperm.xlu0 %2422, %v2245_v19  }
  0x2d   : > { %921 = vperm.xlu1 %2423, %v2246_v22  }
  0x30   : > { %1001 = vperm.xlu0 %2422, %v2248_v21  }
  0x31   : > { %1006 = vperm.xlu1 %2423, %v2249_v24  }
  0x34   : > { %1086 = vperm.xlu0 %2422, %v2251_v23  }
  0x35   : > { %1091 = vperm.xlu1 %2423, %v2252_v26  }
  0x38   : > { %1171 = vperm.xlu0 %2422, %v2254_v25  }
  0x39   : > { %1176 = vperm.xlu1 %2423, %v2255_v28  }
  0x3c   : > { %1256 = vperm.xlu0 %2422, %v2257_v27  }
  0x3d   : > { %1261 = vperm.xlu1 %2423, %v2258_v30  }
  0x40   : > { %1341 = vperm.xlu0 %2422, %v2260_v29  }
  0x41   : > { %1346 = vperm.xlu1 %2423, %v2261_v31  }
  0x93   : > { %v2743_v33 = vpop.permute.xlu0 %450  ;;  %v2813_v16 = vpop.permute.xlu1 %648 }
  0x97   : > { %v456_v44 = vpop.permute.xlu0 %455 }
  0x98   : > { %v2825_v26 = vpop.permute.xlu1 %653 }
  0x9b   : > { %v2821_v21 = vpop.permute.xlu0 %669 }
  0x9c   : > { %v2839_v31 = vpop.permute.xlu1 %674 }
  0x9f   : > { %v2835_v30 = vpop.permute.xlu0 %746 }
  0xe2   : > { %v535_v34 = vpop.f32.mrf.mxu0  ;;  %v586_v35 = vpop.f32.mrf.mxu1 }
  0xe3   : > { %v536_v36 = vadd.f32 %v535_v34, %v2743_v33  ;;  %v587_v37 = vadd.f32 %v586_v35, %v2743_v33  ;;  %v2851_v34 = vpop.permute.xlu0 %831 }
  0xe4   : > { %v537_v38 = vpop.f32.mrf.mxu0  ;;  %v588_v39 = vpop.f32.mrf.mxu1 }
  0xe5   : > { %v603_v40 = vadd.f32 3.0, %v536_v36  ;;  %v605_v41 = vadd.f32 3.0, %v587_v37  ;;  %v538_v2 = vadd.f32 %v537_v38, %v2743_v33  ;;  %v589_v5 = vadd.f32 %v588_v39, %v2743_v33  ;;  %v2847_v33 = vpop.permute.xlu1 %751 }
  0xe6   : > { %v539_v42 = vpop.f32.mrf.mxu0  ;;  %v590_v43 = vpop.f32.mrf.mxu1 }
  0xe7   : > { %v611_v45 = vmax.f32 %v603_v40, 0.0  ;;  %v613_v46 = vmax.f32 %v605_v41, 0.0  ;;  %v540_v47 = vadd.f32 %v539_v42, %v456_v44  ;;  %v591_v48 = vadd.f32 %v590_v43, %v456_v44  ;;  %v2430_v43 = vld [vmem:[%s3719_s2 + $0x78] sm:$0xff]  }
  0xe8   : > { %v541_v3 = vpop.f32.mrf.mxu0  ;;  %v604_v4 = vadd.f32 3.0, %v538_v2  ;;  %v592_v7 = vpop.f32.mrf.mxu1  ;;  %v606_v9 = vadd.f32 3.0, %v589_v5  ;;  %2311 = vmatprep.subr.bf16.mxu0 %v2430_v43  ;;  %v2457_v43 = vld [vmem:[%s3719_s2 + $0xc8] sm:$0xff]  }
  0xe9   : > { %v619_v49 = vmin.f32 %v611_v45, 6.0  ;;  %v621_v50 = vmin.f32 %v613_v46, 6.0  ;;  %v607_v51 = vadd.f32 3.0, %v540_v47  ;;  %v609_v52 = vadd.f32 3.0, %v591_v48  ;;  %v2857_v35 = vpop.permute.xlu1 %836 }
  0xea   : > { %v542_v6 = vadd.f32 %v541_v3, %v456_v44  ;;  %v612_v8 = vmax.f32 %v604_v4, 0.0  ;;  %v593_v11 = vadd.f32 %v592_v7, %v456_v44  ;;  %v614_v13 = vmax.f32 %v606_v9, 0.0  ;;  %v2431_v44 = vld [vmem:[%s3719_s2 + $0x38] sm:$0xff]   ;;  %v2447_v7 = vld [vmem:[%s3719_s2 + $0xa0] sm:$0xff]  }
  0xeb   : > { %v627_v53 = vmul.f32 %v619_v49, %v536_v36  ;;  %v615_v54 = vmax.f32 %v607_v51, 0.0  ;;  %v617_v55 = vmax.f32 %v609_v52, 0.0  ;;  %v629_v57 = vmul.f32 %v621_v50, %v587_v37  ;;  %v2859_v36 = vpop.permute.xlu0 %916  ;;  %2312 = vmatpush3.bf16.msra.mxu0 %v2431_v44  ;;  %v2434_v49 = vld [vmem:[%s3719_s2 + $0x30] sm:$0xff]   ;;  %v2435_v50 = vld [vmem:[%s3719_s2 + $0xb8] sm:$0xff]   ;;  %v2436_v51 = vld [vmem:[%s3719_s2 + $0x68] sm:$0xff]  }
  0xec   : > { %v608_v10 = vadd.f32 3.0, %v542_v6  ;;  %v620_v12 = vmin.f32 %v612_v8, 6.0  ;;  %v610_v15 = vadd.f32 3.0, %v593_v11  ;;  %v622_v18 = vmin.f32 %v614_v13, 6.0  ;;  %v2437_v52 = vld [vmem:[%s3719_s2 + $0xf0] sm:$0xff]   ;;  %v2444_v4 = vld [vmem:[%s3719_s2 + $0x58] sm:$0xff]  }
  0xed   : > { %v2747_v56 = vmul.f32 0.16666667, %v627_v53  ;;  %v623_v58 = vmin.f32 %v615_v54, 6.0  ;;  %v625_v59 = vmin.f32 %v617_v55, 6.0  ;;  %v2751_v61 = vmul.f32 0.16666667, %v629_v57  ;;  %v2867_v37 = vpop.permute.xlu1 %921 }
  0xee   : > { %v616_v14 = vmax.f32 %v608_v10, 0.0  ;;  %v628_v17 = vmul.f32 %v620_v12, %v538_v2  ;;  %v618_v20 = vmax.f32 %v610_v15, 0.0  ;;  %v630_v23 = vmul.f32 %v622_v18, %v589_v5  ;;  %v2438_v54 = vld [vmem:[%s3719_s2 + $0x28] sm:$0xff]   ;;  %v2439_v55 = vld [vmem:[%s3719_s2 + $0xb0] sm:$0xff]   ;;  %v2445_v5 = vld [vmem:[%s3719_s2 + $0xe0] sm:$0xff]  }
  0xef   : > { %685 = vrot.lane.b32.xlu0 %v2747_v56, %s2526_s15  ;;  %v631_v60 = vmul.f32 %v623_v58, %v540_v47  ;;  %v633_v63 = vmul.f32 %v625_v59, %v591_v48  ;;  %v2871_v38 = vpop.permute.xlu0 %1001  ;;  %v2432_v47 = vld [vmem:[%s3719_s2 + $0x70] sm:$0xff]   ;;  %v2433_v48 = vld [vmem:[%s3719_s2 + $0xf8] sm:$0xff]   ;;  %v2440_v58 = vld [vmem:[%s3719_s2 + $0x60] sm:$0xff]   ;;  %v658_v0 = vmul.f32 %v2813_v16, %v2751_v61 }
  0xf0   : > { %v624_v19 = vmin.f32 %v616_v14, 6.0  ;;  %v2823_v22 = vmul.f32 0.16666667, %v628_v17  ;;  %v626_v25 = vmin.f32 %v618_v20, 6.0  ;;  %v2831_v27 = vmul.f32 0.16666667, %v630_v23  ;;  %2313 = vmatprep.subr.bf16.mxu0 %v2432_v47  ;;  %2333 = vmatprep.subr.bf16.mxu1 %v2433_v48 }
  0xf1   : > { %v2753_v62 = vmul.f32 0.16666667, %v631_v60  ;;  %v2759_v1 = vmul.f32 0.16666667, %v633_v63  ;;  %v2877_v39 = vpop.permute.xlu1 %1006  ;;  %2314 = vmatpush3.bf16.msra.mxu0 %v2434_v49  ;;  %2334 = vmatpush3.bf16.msra.mxu1 %v2435_v50  ;;  %v2441_v59 = vld [vmem:[%s3719_s2 + $0xe8] sm:$0xff]   ;;  %v2442_v60 = vld [vmem:[%s3719_s2 + $0x20] sm:$0xff]  }
  0xf2   : > { %v632_v24 = vmul.f32 %v624_v19, %v542_v6  ;;  %v634_v29 = vmul.f32 %v626_v25, %v593_v11  ;;  %3782 = vst [vmem:[#allocation8_spill] sm:$0xff] %v2877_v39  ;;  %2315 = vmatprep.subr.bf16.mxu0 %v2436_v51  ;;  %2335 = vmatprep.subr.bf16.mxu1 %v2437_v52  ;;  %v2443_v63 = vld [vmem:[%s3719_s2 + $0xa8] sm:$0xff]   ;;  %v2446_v6 = vld [vmem:[%s3719_s2 + $0x18] sm:$0xff]   ;;  %v2448_v10 = vld [vmem:[%s3719_s2 + $0x50] sm:$0xff]   ;;  %v3050_v52 = vpop.f32.mrf.mxu0 }
  0xf3   : > { %693 = vrot.lane.b32.xlu0 %v2751_v61, %s2526_s15  ;;  %687 = vrot.lane.b32.xlu1 %v2753_v62, %s2526_s15  ;;  %v2879_v40 = vpop.permute.xlu0 %1086  ;;  %v2449_v11 = vld [vmem:[%s3719_s2 + $0xd8] sm:$0xff]   ;;  %v2450_v12 = vld [vmem:[%s3719_s2 + $0x10] sm:$0xff]   ;;  %3792 = vst [vmem:[#allocation17_spill] sm:$0xff] %v3050_v52  ;;  %v662_v52 = vmul.f32 %v2825_v26, %v2759_v1 }
  0xf4   : > { %v2833_v28 = vmul.f32 0.16666667, %v632_v24  ;;  %v2843_v32 = vmul.f32 0.16666667, %v634_v29  ;;  %3783 = vst [vmem:[#allocation9_spill] sm:$0xff] %v2879_v40  ;;  %v2451_v13 = vld [vmem:[%s3719_s2 + $0x98] sm:$0xff]  }
  0xf5   : > { %v2887_v41 = vpop.permute.xlu1 %1091  ;;  %2316 = vmatpush3.bf16.msra.mxu0 %v2438_v54  ;;  %2336 = vmatpush3.bf16.msra.mxu1 %v2439_v55  ;;  %v2452_v17 = vld [vmem:[%s3719_s2 + $0x48] sm:$0xff]   ;;  %v2453_v18 = vld [vmem:[%s3719_s2 + $0xd0] sm:$0xff]   ;;  %v1751_v19 = vld [vmem:[%s3725_s8] sm:$0xf]  ;;  %v3052_v54 = vpop.f32.mrf.mxu1 }
  0xf6   : > { %3784 = vst [vmem:[#allocation10_spill] sm:$0xff] %v2887_v41  ;;  %2317 = vmatprep.subr.bf16.mxu0 %v2440_v58  ;;  %2337 = vmatprep.subr.bf16.mxu1 %v2441_v59  ;;  %v2454_v20 = vld [vmem:[%s3719_s2 + $0x8] sm:$0xff]   ;;  %v2455_v23 = vld [vmem:[%s3719_s2 + $0x90] sm:$0xff]   ;;  %v2456_v29 = vld [vmem:[%s3719_s2 + $0x40] sm:$0xff]  }
  0xf7   : > { %770 = vrot.lane.b32.xlu0 %v2747_v56, %s2527_s16  ;;  %695 = vrot.lane.b32.xlu1 %v2759_v1, %s2526_s15  ;;  %v2891_v42 = vpop.permute.xlu0 %1171  ;;  %v1807_v44 = vld [vmem:[%s3727_s10 + $0x8] sm:$0xff]  ;;  %v2458_v47 = vld [vmem:[%s3719_s2] sm:$0xff]   ;;  %3793 = vst [vmem:[#allocation18_spill] sm:$0xff] %v3052_v54  ;;  %v661_v54 = vmul.f32 %v2825_v26, %v2833_v28 }
  0xf8   : > { %3785 = vst [vmem:[#allocation11_spill] sm:$0xff] %v2891_v42  ;;  %v2459_v48 = vld [vmem:[%s3719_s2 + $0x88] sm:$0xff]   ;;  %v1806_v50 = vld [vmem:[%s3727_s10] sm:$0xff]  ;;  %v447_v58 = vld [vmem:[%s3722_s5 + $0x10] sm:$0xff] }
  0xf9   : > { %v2903_v45 = vpop.permute.xlu1 %1176  ;;  %2318 = vmatpush3.bf16.msra.mxu0 %v2442_v60  ;;  %2338 = vmatpush3.bf16.msra.mxu1 %v2443_v63  ;;  %v2460_v55 = vld [vmem:[%s3719_s2 + $0xc0] sm:$0xff]   ;;  %v2253_v42 = vld [vmem:[%s3718_s1 + $0x18] sm:$0xf] }
  0xfa   : > { %3786 = vst [vmem:[#allocation12_spill] sm:$0xff] %v2903_v45  ;;  %2319 = vmatprep.subr.bf16.mxu0 %v2444_v4  ;;  %2339 = vmatprep.subr.bf16.mxu1 %v2445_v5  ;;  %v2461_v59 = vld [vmem:[%s3719_s2 + $0x80] sm:$0xff]   ;;  %v3068_v4 = vpop.f32.mrf.mxu0  ;;  %v2250_v45 = vld [vmem:[%s3718_s1 + $0x14] sm:$0xf] }
  0xfb   : > { %778 = vrot.lane.b32.xlu0 %v2751_v61, %s2527_s16  ;;  %772 = vrot.lane.b32.xlu1 %v2753_v62, %s2527_s16  ;;  %v2905_v46 = vpop.permute.xlu0 %1256  ;;  %v2025_v63 = vld [vmem:[%s3729_s12] sm:$0xff]  ;;  %3794 = vst [vmem:[#allocation19_spill] sm:$0xff] %v3068_v4  ;;  %v660_v4 = vmul.f32 %v2825_v26, %v2753_v62 }
  0xfc   : > { %3787 = vst [vmem:[#allocation13_spill] sm:$0xff] %v2905_v46 }
  0xfd   : > { %v2931_v53 = vpop.permute.xlu1 %1261  ;;  %2320 = vmatpush3.bf16.msra.mxu0 %v2446_v6  ;;  %2340 = vmatpush3.bf16.msra.mxu1 %v2447_v7  ;;  %v3072_v6 = vpop.f32.mrf.mxu1 }
  0xfe   : > { %3788 = vst [vmem:[#allocation14_spill] sm:$0xff] %v2931_v53  ;;  %2321 = vmatprep.subr.bf16.mxu0 %v2448_v10  ;;  %2341 = vmatprep.subr.bf16.mxu1 %v2449_v11  ;;  %3795 = vst [vmem:[#allocation20_spill] sm:$0xff] %v3072_v6  ;;  %v549_v7 = vpop.f32.mrf.mxu0  ;;  %v659_v6 = vmul.f32 %v2813_v16, %v2831_v27 }
  0xff   : > { %855 = vrot.lane.b32.xlu0 %v2747_v56, %s2528_s20  ;;  %780 = vrot.lane.b32.xlu1 %v2759_v1, %s2527_s16  ;;  %v2941_v57 = vpop.permute.xlu0 %1341  ;;  %v600_v10 = vpop.f32.mrf.mxu1 }
 0x100   : > { %3789 = vst [vmem:[#allocation15_spill] sm:$0xff] %v2941_v57  ;;  %v2241_v57 = vld [vmem:[%s3718_s1 + $0x4] sm:$0xf]  ;;  %v3156_v53 = vadd.f32 %v2821_v21, %v659_v6 }
 0x101   : > { %v2961_v3 = vpop.permute.xlu1 %1346  ;;  %2322 = vmatpush3.bf16.msra.mxu0 %v2450_v12  ;;  %2342 = vmatpush3.bf16.msra.mxu1 %v2451_v13  ;;  %v550_v12 = vpop.f32.mrf.mxu0 }
 0x102   : > { %3790 = vst [vmem:[#allocation16_spill] sm:$0xff] %v2961_v3  ;;  %2323 = vmatprep.subr.bf16.mxu0 %v2452_v17  ;;  %2343 = vmatprep.subr.bf16.mxu1 %v2453_v18  ;;  %v601_v17 = vpop.f32.mrf.mxu1  ;;  %v656_v12 = vmul.f32 %v2813_v16, %v2747_v56 }
 0x103   : > { %863 = vrot.lane.b32.xlu0 %v2751_v61, %s2528_s20  ;;  %857 = vrot.lane.b32.xlu1 %v2753_v62, %s2528_s20  ;;  %v657_v17 = vmul.f32 %v2813_v16, %v2823_v22 }
 0x105   : > { %2324 = vmatpush3.bf16.msra.mxu0 %v2454_v20  ;;  %2344 = vmatpush3.bf16.msra.mxu1 %v2455_v23 }
 0x106   : > { %2325 = vmatprep.subr.bf16.mxu0 %v2456_v29  ;;  %2345 = vmatprep.subr.bf16.mxu1 %v2457_v43 }
 0x107   : > { %940 = vrot.lane.b32.xlu0 %v2747_v56, %s2529_s21  ;;  %865 = vrot.lane.b32.xlu1 %v2759_v1, %s2528_s20 }
 0x109   : > { %2326 = vmatpush3.bf16.msra.mxu0 %v2458_v47  ;;  %2346 = vmatpush3.bf16.msra.mxu1 %v2459_v48 }
 0x10a   : > { %2347 = vmatprep.subr.bf16.mxu1 %v2460_v55 }
 0x10b   : > { %948 = vrot.lane.b32.xlu0 %v2751_v61, %s2529_s21  ;;  %942 = vrot.lane.b32.xlu1 %v2753_v62, %s2529_s21 }
 0x10d   : > { %2348 = vmatpush3.bf16.msra.mxu1 %v2461_v59  ;;  %v701_v59 = vlaneseq }
 0x10f   : > { %1025 = vrot.lane.b32.xlu0 %v2747_v56, %s2530_s22  ;;  %950 = vrot.lane.b32.xlu1 %v2759_v1, %s2529_s21  ;;  %v3106_v10 = vshrl.u32 %v701_v59, 7 }
 0x111   : > { %3807 = vst [vmem:[#allocation32_spill] sm:$0xff] %v3106_v10  ;;  %v3131_v16 = vsub.s32 1, %v3106_v10 }
 0x113   : > { %1033 = vrot.lane.b32.xlu0 %v2751_v61, %s2530_s22  ;;  %1027 = vrot.lane.b32.xlu1 %v2753_v62, %s2530_s22 }
 0x117   : > { %1110 = vrot.lane.b32.xlu0 %v2747_v56, %s2531_s24  ;;  %1035 = vrot.lane.b32.xlu1 %v2759_v1, %s2530_s22 }
 0x11b   : > { %1118 = vrot.lane.b32.xlu0 %v2751_v61, %s2531_s24  ;;  %1112 = vrot.lane.b32.xlu1 %v2753_v62, %s2531_s24 }
 0x11f   : > { %1195 = vrot.lane.b32.xlu0 %v2747_v56, %s2532_s27  ;;  %1120 = vrot.lane.b32.xlu1 %v2759_v1, %s2531_s24 }
 0x123   : > { %1203 = vrot.lane.b32.xlu0 %v2751_v61, %s2532_s27  ;;  %1197 = vrot.lane.b32.xlu1 %v2753_v62, %s2532_s27 }
 0x127   : > { %1280 = vrot.lane.b32.xlu0 %v2747_v56, %s3734_s14  ;;  %1205 = vrot.lane.b32.xlu1 %v2759_v1, %s2532_s27  ;;  %v663_v56 = vmul.f32 %v2825_v26, %v2843_v32  ;;  %v3146_v26 = vadd.f32 %v2821_v21, %v656_v12  ;;  %v3165_v12 = vadd.f32 %v2839_v31, %v662_v52  ;;  %v2247_v52 = vld [vmem:[%s3718_s1 + $0xc] sm:$0xf] }
 0x12b   : > { %1288 = vrot.lane.b32.xlu0 %v2751_v61, %s3734_s14  ;;  %1282 = vrot.lane.b32.xlu1 %v2753_v62, %s3734_s14  ;;  %v3128_v61 = vand.u32 127, %v701_v59  ;;  %v3134_v62 = vsub.s32 2, %v3106_v10  ;;  %v679_v59 = vadd.f32 %v2821_v21, %v658_v0  ;;  %v2244_v0 = vld [vmem:[%s3718_s1 + $0x8] sm:$0xf] }
 0x12c   : > { %v3203_v46 = vrot.slane %v2244_v0, %v3131_v16 }
 0x12d   : > { %vm703_vm2 = vcmp.lt.s32.totalorder %v3128_v61, 17  ;;  %vm786_vm3 = vcmp.lt.s32.totalorder %v3128_v61, 16  ;;  %vm871_vm4 = vcmp.lt.s32.totalorder %v3128_v61, 15  ;;  %vm956_vm5 = vcmp.lt.s32.totalorder %v3128_v61, 1 }
 0x12e   : > { %vm1041_vm6 = vcmp.lt.s32.totalorder %v3128_v61, 127  ;;  %vm1126_vm7 = vcmp.lt.s32.totalorder %v3128_v61, 113  ;;  %vm1211_vm8 = vcmp.lt.s32.totalorder %v3128_v61, 112  ;;  %vm1296_vm9 = vcmp.lt.s32.totalorder %v3128_v61, 111 }
 0x12f   : > { %689 = vrot.lane.b32.xlu0 %v2823_v22, %s2526_s15  ;;  %1290 = vrot.lane.b32.xlu1 %v2759_v1, %s3734_s14  ;;  %v3140_v1 = vsub.s32 0, %v3106_v10  ;;  %s431_s14 = sand.u32 1, %s2515_s26  }
 0x130   : > { %s2145_s29 = scalar_lea.sflag [#allocation3], %s431_s14 }
 0x131   : > { %v3244_v39 = vrot.slane %v2250_v45, %v3140_v1 }
 0x133   : > { %697 = vrot.lane.b32.xlu0 %v2831_v27, %s2526_s15  ;;  %691 = vrot.lane.b32.xlu1 %v2833_v28, %s2526_s15  ;;  %3815 = vst [vmem:[#allocation40_spill] sm:$0xff] %v3244_v39  ;;  %v3263_v39 = vrot.slane %v2253_v42, %v3134_v62 }
 0x135   : > { %3821 = vst [vmem:[#allocation46_spill] sm:$0xff] %v3263_v39 }
 0x137   : > { %774 = vrot.lane.b32.xlu0 %v2823_v22, %s2527_s16  ;;  %699 = vrot.lane.b32.xlu1 %v2843_v32, %s2526_s15 }
 0x13b   : > { %782 = vrot.lane.b32.xlu0 %v2831_v27, %s2527_s16  ;;  %776 = vrot.lane.b32.xlu1 %v2833_v28, %s2527_s16 }
 0x13f   : > { %859 = vrot.lane.b32.xlu0 %v2823_v22, %s2528_s20  ;;  %784 = vrot.lane.b32.xlu1 %v2843_v32, %s2527_s16 }
 0x143   : > { %867 = vrot.lane.b32.xlu0 %v2831_v27, %s2528_s20  ;;  %861 = vrot.lane.b32.xlu1 %v2833_v28, %s2528_s20 }
 0x147   : > { %944 = vrot.lane.b32.xlu0 %v2823_v22, %s2529_s21  ;;  %869 = vrot.lane.b32.xlu1 %v2843_v32, %s2528_s20  ;;  %s3680_s20 = scalar_lea.hbm %s3730_s13, %s2310_s23 }
 0x14b   : > { %952 = vrot.lane.b32.xlu0 %v2831_v27, %s2529_s21  ;;  %946 = vrot.lane.b32.xlu1 %v2833_v28, %s2529_s21 }
 0x14f   : > { %1029 = vrot.lane.b32.xlu0 %v2823_v22, %s2530_s22  ;;  %954 = vrot.lane.b32.xlu1 %v2843_v32, %s2529_s21  ;;  %s2537_s21 = smov [#allocation2]  }
 0x153   : > { %1037 = vrot.lane.b32.xlu0 %v2831_v27, %s2530_s22  ;;  %1031 = vrot.lane.b32.xlu1 %v2833_v28, %s2530_s22 }
 0x157   : > { %1114 = vrot.lane.b32.xlu0 %v2823_v22, %s2531_s24  ;;  %1039 = vrot.lane.b32.xlu1 %v2843_v32, %s2530_s22 }
 0x15b   : > { %1122 = vrot.lane.b32.xlu0 %v2831_v27, %s2531_s24  ;;  %1116 = vrot.lane.b32.xlu1 %v2833_v28, %s2531_s24 }
 0x15f   : > { %1199 = vrot.lane.b32.xlu0 %v2823_v22, %s2532_s27  ;;  %1124 = vrot.lane.b32.xlu1 %v2843_v32, %s2531_s24 }
 0x161   : > { %v2959_v2 = vpop.permute.xlu0 %685 }
 0x163   : > { %1207 = vrot.lane.b32.xlu0 %v2831_v27, %s2532_s27  ;;  %1201 = vrot.lane.b32.xlu1 %v2833_v28, %s2532_s27 }
 0x165   : > { %v2979_v8 = vpop.permute.xlu0 %693  ;;  %v2981_v9 = vpop.permute.xlu1 %687 }
 0x167   : > { %1284 = vrot.lane.b32.xlu0 %v2823_v22, %s3791_s17  ;;  %1209 = vrot.lane.b32.xlu1 %v2843_v32, %s2532_s27  ;;  %s2467_s27 = sshll.u32 %s2537_s21, 4  ;;  %s2468_s27 = int_to_ptr.vmem [resolvable:$false] %s2467_s27 }
 0x169   : > { %v2999_v14 = vpop.permute.xlu0 %770  ;;  %v3001_v15 = vpop.permute.xlu1 %695 }
 0x16b   : > { %1292 = vrot.lane.b32.xlu0 %v2831_v27, %s3791_s17  ;;  %1286 = vrot.lane.b32.xlu1 %v2833_v28, %s3791_s17  ;;  %v712_v27 = vld [vmem:[%s3718_s1] sm:$0xf]  ;;  %v3143_v28 = vsub.s32 3, %v3106_v10  ;;  %v3162_v10 = vadd.f32 %v2839_v31, %v661_v54 }
 0x16c   : > { %v725_v54 = vrot.slane %v712_v27, %v3134_v62  ;;  %v3184_v6 = vrot.slane %v712_v27, %v3140_v1 }
 0x16d   : > { %v3022_v24 = vpop.permute.xlu0 %778  ;;  %v3024_v25 = vpop.permute.xlu1 %772 }
 0x16f   : > { %1754 = vperm.xlu0 %2422, %v1751_v19   ;;  %1294 = vrot.lane.b32.xlu1 %v2843_v32, %s3791_s17  ;;  %v3149_v32 = vadd.f32 %v2821_v21, %v657_v17  ;;  %s2222_s17 = sshll.u32 %s431_s14, 5 }
 0x170   : > { %s433_s24 = scalar_lea.vmem [#allocation2], %s2222_s17  ;;  %s2469_s17 = scalar_lea.vmem %s2468_s27, 1024 }
 0x171   : > { %v3043_v49 = vpop.permute.xlu0 %855  ;;  %v3048_v51 = vpop.permute.xlu1 %780  ;;  %s2159_s30 = sshll.u32 %s433_s24, 4  ;;  %s2160_s30 = int_to_ptr.vmem [resolvable:$true] %s2159_s30 }
 0x172   : > { %s2463_s22 = scalar_lea.vmem %s2160_s30, 512  ;;  %p2470_p0 = scmp.lt.s32.totalorder %s2160_s30, %s2468_s27 }
 0x173   : > { %1815 = vperm.xlu0 %2422, %v1807_v44   ;;  %1810 = vperm.xlu1 %2423, %v1806_v50   ;;  %p2464_p11 = scmp.ne.s32.totalorder %s2160_s30, %s2463_s22  ;;  %p2471_p1 = scmp.lt.s32.totalorder %s2469_s17, %s2463_s22 }
 0x175   : > { %v3063_v60 = vpop.permute.xlu0 %863  ;;  %v3070_v5 = vpop.permute.xlu1 %857  ;;  %p2465_p12 = pnand %p2464_p11, %p2646_p5  ;;  %p2472_p2 = por %p2471_p1, %p2470_p0 }
 0x177   : > { %460 = vperm.xlu0 %2422, %v447_v58   ;;  %2028 = vperm.xlu1 %2423, %v2025_v63   ;;  %p2466_p13 = pneg %p2465_p12 }
 0x179   : > { %v3074_v11 = vpop.permute.xlu0 %940  ;;  %v3076_v13 = vpop.permute.xlu1 %865  ;;  %p2473_p3 = pnand %p2472_p2, %p2466_p13 }
 0x17d   : > { %v3078_v18 = vpop.permute.xlu0 %948  ;;  %v3080_v19 = vpop.permute.xlu1 %942 }
 0x181   : > { %v3082_v20 = vpop.permute.xlu0 %1025  ;;  %v3084_v23 = vpop.permute.xlu1 %950 }
 0x182   : > { %3796 = vst [vmem:[#allocation21_spill] sm:$0xff] %v3082_v20  ;;  %v3247_v20 = vrot.slane %v2250_v45, %v3131_v16 }
 0x184   : > { %3816 = vst [vmem:[#allocation41_spill] sm:$0xff] %v3247_v20  ;;  %v3266_v20 = vrot.slane %v2253_v42, %v3143_v28 }
 0x185   : > { %v3086_v29 = vpop.permute.xlu0 %1033  ;;  %v3088_v43 = vpop.permute.xlu1 %1027 }
 0x186   : > { %3797 = vst [vmem:[#allocation22_spill] sm:$0xff] %v3086_v29  ;;  %3798 = vst [vmem:[#allocation23_spill] sm:$0xff] %v3088_v43  ;;  %v3238_v43 = vrot.slane %v2247_v52, %v3143_v28  ;;  %v3253_v29 = vrot.slane %v2250_v45, %v3143_v28 }
 0x187   : > { %3822 = vst [vmem:[#allocation47_spill] sm:$0xff] %v3266_v20 }
 0x188   : > { %3814 = vst [vmem:[#allocation39_spill] sm:$0xff] %v3238_v43  ;;  %3818 = vst [vmem:[#allocation43_spill] sm:$0xff] %v3253_v29  ;;  %v3259_v43 = vrot.slane %v2253_v42, %v3131_v16 }
 0x189   : > { %v3090_v44 = vpop.permute.xlu0 %1110  ;;  %v3092_v47 = vpop.permute.xlu1 %1035 }
 0x18a   : > { %3799 = vst [vmem:[#allocation24_spill] sm:$0xff] %v3090_v44  ;;  %3800 = vst [vmem:[#allocation25_spill] sm:$0xff] %v3092_v47  ;;  %v2256_v47 = vld [vmem:[%s3718_s1 + $0x1c] sm:$0xf] }
 0x18b   : > { %3820 = vst [vmem:[#allocation45_spill] sm:$0xff] %v3259_v43  ;;  %v3281_v39 = vrot.slane %v2256_v47, %v3134_v62 }
 0x18d   : > { %v3094_v48 = vpop.permute.xlu0 %1118  ;;  %v3096_v50 = vpop.permute.xlu1 %1112  ;;  %3825 = vst [vmem:[#allocation50_spill] sm:$0xff] %v3281_v39 }
 0x18e   : > { %3801 = vst [vmem:[#allocation26_spill] sm:$0xff] %v3094_v48  ;;  %3802 = vst [vmem:[#allocation27_spill] sm:$0xff] %v3096_v50  ;;  %v3215_v50 = vrot.slane %v2244_v0, %v3143_v28  ;;  %v3235_v48 = vrot.slane %v2247_v52, %v3140_v1 }
 0x190   : > { %3813 = vst [vmem:[#allocation38_spill] sm:$0xff] %v3235_v48 }
 0x191   : > { %v3098_v55 = vpop.permute.xlu0 %1195  ;;  %v3100_v58 = vpop.permute.xlu1 %1120 }
 0x192   : > { %3803 = vst [vmem:[#allocation28_spill] sm:$0xff] %v3098_v55  ;;  %3804 = vst [vmem:[#allocation29_spill] sm:$0xff] %v3100_v58  ;;  %v3221_v58 = vrot.slane %v2247_v52, %v3134_v62 }
 0x195   : > { %v3102_v63 = vpop.permute.xlu0 %1203  ;;  %v3104_v7 = vpop.permute.xlu1 %1197 }
 0x196   : > { %3805 = vst [vmem:[#allocation30_spill] sm:$0xff] %v3102_v63  ;;  %3806 = vst [vmem:[#allocation31_spill] sm:$0xff] %v3104_v7  ;;  %v3173_v7 = vadd.f32 %v2839_v31, %v663_v56  ;;  %v3193_v56 = vrot.slane %v2241_v57, %v3134_v62  ;;  %v3212_v63 = vrot.slane %v2244_v0, %v3140_v1 }
 0x199   : > { %v3122_v3 = vpop.permute.xlu0 %1280  ;;  %v3126_v22 = vpop.permute.xlu1 %1205 }
 0x19a   : > { %3808 = vst [vmem:[#allocation33_spill] sm:$0xff] %v3122_v3  ;;  %3809 = vst [vmem:[#allocation34_spill] sm:$0xff] %v3126_v22  ;;  %v3159_v3 = vadd.f32 %v2839_v31, %v660_v4  ;;  %v721_v4 = vrot.slane %v712_v27, %v3131_v16  ;;  %v3190_v31 = vrot.slane %v2241_v57, %v3131_v16 }
 0x19b   : > { %v3200_v22 = vrot.slane %v2241_v57, %v3143_v28 }
 0x19d   : > { %v3167_v17 = vpop.permute.xlu0 %1288  ;;  %v3175_v21 = vpop.permute.xlu1 %1282 }
 0x19e   : > { %3810 = vst [vmem:[#allocation35_spill] sm:$0xff] %v3167_v17  ;;  %3811 = vst [vmem:[#allocation36_spill] sm:$0xff] %v3175_v21  ;;  %v3187_v17 = vrot.slane %v712_v27, %v3143_v28  ;;  %v3197_v21 = vrot.slane %v2241_v57, %v3140_v1  ;;  %v3206_v27 = vrot.slane %v2244_v0, %v3134_v62 }
 0x19f   : > { %v3218_v57 = vrot.slane %v2247_v52, %v3131_v16  ;;  %v3256_v52 = vrot.slane %v2253_v42, %v3140_v1  ;;  %v2259_v42 = vld [vmem:[%s3718_s1 + $0x20] sm:$0xf] }
 0x1a1   : > { %v690_v55 = vpop.permute.xlu0 %689  ;;  %v3226_v41 = vpop.permute.xlu1 %1290  ;;  %3819 = vst [vmem:[#allocation44_spill] sm:$0xff] %v3256_v52 }
 0x1a2   : > { %3812 = vst [vmem:[#allocation37_spill] sm:$0xff] %v3226_v41  ;;  %v706_v44 = vsel %vm703_vm2, %v690_v55, %v2979_v8  ;;  %v708_v0 = vsel %vm703_vm2, %v2959_v2, %v690_v55  ;;  %v3250_v55 = vrot.slane %v2250_v45, %v3134_v62 }
 0x1a3   : > { %v735_v40 = vmul.f32 %v721_v4, %v708_v0  ;;  %v736_v41 = vmul.f32 %v725_v54, %v706_v44 }
 0x1a4   : > { %3817 = vst [vmem:[#allocation42_spill] sm:$0xff] %v3250_v55  ;;  %v3269_v55 = vrot.slane %v2256_v47, %v3140_v1 }
 0x1a5   : > { %v756_v44 = vmul.f32 %v2835_v30, %v736_v41  ;;  %v698_v0 = vpop.permute.xlu0 %697  ;;  %v692_v45 = vpop.permute.xlu1 %691  ;;  %v3278_v41 = vrot.slane %v2256_v47, %v3131_v16 }
 0x1a6   : > { %3823 = vst [vmem:[#allocation48_spill] sm:$0xff] %v3269_v55  ;;  %v704_v52 = vsel %vm703_vm2, %v2979_v8, %v698_v0  ;;  %v710_v43 = vsel %vm703_vm2, %v698_v0, %v2959_v2  ;;  %v755_v55 = vmul.f32 %v2835_v30, %v735_v40  ;;  %v707_v8 = vsel %vm703_vm2, %v692_v45, %v3001_v15 }
 0x1a7   : > { %3824 = vst [vmem:[#allocation49_spill] sm:$0xff] %v3278_v41  ;;  %v764_v20 = vadd.f32 %v756_v44, %v679_v59  ;;  %v709_v2 = vsel %vm703_vm2, %v2981_v9, %v692_v45  ;;  %v740_v41 = vmul.f32 %v725_v54, %v707_v8  ;;  %v734_v29 = vmul.f32 %v3184_v6, %v710_v43 }
 0x1a8   : > { %v739_v0 = vmul.f32 %v721_v4, %v709_v2  ;;  %v737_v39 = vmul.f32 %v3187_v17, %v704_v52  ;;  %v3297_v40 = vrot.slane %v2256_v47, %v3143_v28  ;;  %v3300_v59 = vrot.slane %v2259_v42, %v3140_v1 }
 0x1a9   : > { %v775_v48 = vpop.permute.xlu0 %774  ;;  %v3303_v44 = vrot.slane %v2259_v42, %v3131_v16  ;;  %v3306_v45 = vrot.slane %v2259_v42, %v3134_v62  ;;  %v760_v43 = vmul.f32 %v2847_v33, %v740_v41  ;;  %v754_v54 = vmul.f32 %v2835_v30, %v734_v29  ;;  %v700_v8 = vpop.permute.xlu1 %699 }
 0x1aa   : > { %v759_v4 = vmul.f32 %v2847_v33, %v739_v0  ;;  %v757_v52 = vmul.f32 %v2835_v30, %v737_v39  ;;  %v705_v47 = vsel %vm703_vm2, %v3001_v15, %v700_v8  ;;  %v711_v16 = vsel %vm703_vm2, %v700_v8, %v2981_v9 }
 0x1ab   : > { %v789_v62 = vsel %vm786_vm3, %v775_v48, %v3022_v24  ;;  %v791_v1 = vsel %vm786_vm3, %v2999_v14, %v775_v48  ;;  %v763_v29 = vadd.f32 %v755_v55, %v3149_v32  ;;  %v768_v39 = vadd.f32 %v760_v43, %v3165_v12 }
 0x1ac   : > { %v767_v30 = vadd.f32 %v759_v4, %v3162_v10  ;;  %v3328_v15 = vrot.slane %v2259_v42, %v3143_v28  ;;  %v738_v41 = vmul.f32 %v3184_v6, %v711_v16  ;;  %v741_v9 = vmul.f32 %v3187_v17, %v705_v47 }
 0x1ad   : > { %v819_v2 = vmul.f32 %v3190_v31, %v791_v1  ;;  %v820_v0 = vmul.f32 %v3193_v56, %v789_v62  ;;  %v783_v8 = vpop.permute.xlu0 %782  ;;  %v762_v48 = vadd.f32 %v754_v54, %v3146_v26  ;;  %v765_v32 = vadd.f32 %v757_v52, %v3156_v53  ;;  %v777_v55 = vpop.permute.xlu1 %776 }
 0x1ae   : > { %v787_v10 = vsel %vm786_vm3, %v3022_v24, %v783_v8  ;;  %v793_v28 = vsel %vm786_vm3, %v783_v8, %v2999_v14  ;;  %v758_v12 = vmul.f32 %v2847_v33, %v738_v41  ;;  %v761_v17 = vmul.f32 %v2847_v33, %v741_v9 }
 0x1af   : > { %v840_v6 = vmul.f32 %v2851_v34, %v819_v2  ;;  %v841_v42 = vmul.f32 %v2851_v34, %v820_v0  ;;  %v790_v53 = vsel %vm786_vm3, %v777_v55, %v3048_v51  ;;  %v792_v24 = vsel %vm786_vm3, %v3024_v25, %v777_v55 }
 0x1b0   : > { %v818_v26 = vmul.f32 %v3197_v21, %v793_v28  ;;  %v821_v14 = vmul.f32 %v3200_v22, %v787_v10  ;;  %v766_v33 = vadd.f32 %v758_v12, %v3159_v3  ;;  %v769_v4 = vadd.f32 %v761_v17, %v3173_v7 }
 0x1b1   : > { %v848_v43 = vadd.f32 %v840_v6, %v763_v29  ;;  %v849_v54 = vadd.f32 %v841_v42, %v764_v20  ;;  %v860_v52 = vpop.permute.xlu0 %859  ;;  %v823_v47 = vmul.f32 %v3190_v31, %v792_v24  ;;  %v824_v16 = vmul.f32 %v3193_v56, %v790_v53  ;;  %v785_v41 = vpop.permute.xlu1 %784 }
 0x1b2   : > { %v839_v62 = vmul.f32 %v2851_v34, %v818_v26  ;;  %v842_v1 = vmul.f32 %v2851_v34, %v821_v14  ;;  %v788_v9 = vsel %vm786_vm3, %v3048_v51, %v785_v41  ;;  %v794_v3 = vsel %vm786_vm3, %v785_v41, %v3024_v25 }
 0x1b3   : > { %v874_v20 = vsel %vm871_vm4, %v860_v52, %v3063_v60  ;;  %v876_v7 = vsel %vm871_vm4, %v3043_v49, %v860_v52  ;;  %v844_v31 = vmul.f32 %v2857_v35, %v823_v47  ;;  %v845_v34 = vmul.f32 %v2857_v35, %v824_v16 }
 0x1b4   : > { %v847_v56 = vadd.f32 %v839_v62, %v762_v48  ;;  %v850_v29 = vadd.f32 %v842_v1, %v765_v32  ;;  %v822_v51 = vmul.f32 %v3197_v21, %v794_v3  ;;  %v825_v2 = vmul.f32 %v3200_v22, %v788_v9 }
 0x1b5   : > { %v904_v25 = vmul.f32 %v3203_v46, %v876_v7  ;;  %v905_v0 = vmul.f32 %v3206_v27, %v874_v20  ;;  %v868_v8 = vpop.permute.xlu0 %867  ;;  %v852_v55 = vadd.f32 %v844_v31, %v767_v30  ;;  %v853_v10 = vadd.f32 %v845_v34, %v768_v39  ;;  %v862_v28 = vpop.permute.xlu1 %861 }
 0x1b6   : > { %v872_v12 = vsel %vm871_vm4, %v3063_v60, %v868_v8  ;;  %v878_v48 = vsel %vm871_vm4, %v868_v8, %v3043_v49  ;;  %v843_v21 = vmul.f32 %v2857_v35, %v822_v51  ;;  %v846_v22 = vmul.f32 %v2857_v35, %v825_v2  ;;  %v3826_v2 = vld [vmem:[#allocation38_spill] sm:$0xff] }
 0x1b7   : > { %v925_v32 = vmul.f32 %v2859_v36, %v904_v25  ;;  %v926_v17 = vmul.f32 %v2859_v36, %v905_v0  ;;  %v875_v30 = vsel %vm871_vm4, %v862_v28, %v3076_v13  ;;  %v877_v60 = vsel %vm871_vm4, %v3070_v5, %v862_v28  ;;  %v3827_v0 = vld [vmem:[#allocation39_spill] sm:$0xff] }
 0x1b8   : > { %v903_v39 = vmul.f32 %v3212_v63, %v878_v48  ;;  %v906_v49 = vmul.f32 %v3215_v50, %v872_v12  ;;  %v851_v6 = vadd.f32 %v843_v21, %v766_v33  ;;  %v854_v35 = vadd.f32 %v846_v22, %v769_v4 }
 0x1b9   : > { %v933_v42 = vadd.f32 %v925_v32, %v848_v43  ;;  %v934_v53 = vadd.f32 %v926_v17, %v849_v54  ;;  %v945_v24 = vpop.permute.xlu0 %944  ;;  %v908_v26 = vmul.f32 %v3203_v46, %v877_v60  ;;  %v909_v14 = vmul.f32 %v3206_v27, %v875_v30  ;;  %v870_v16 = vpop.permute.xlu1 %869  ;;  %v3828_v60 = vld [vmem:[#allocation22_spill] sm:$0xff] }
 0x1ba   : > { %v924_v52 = vmul.f32 %v2859_v36, %v903_v39  ;;  %v927_v47 = vmul.f32 %v2859_v36, %v906_v49  ;;  %v873_v62 = vsel %vm871_vm4, %v3076_v13, %v870_v16  ;;  %v879_v33 = vsel %vm871_vm4, %v870_v16, %v3070_v5  ;;  %v3830_v49 = vld [vmem:[#allocation8_spill] sm:$0xff] }
 0x1bb   : > { %v959_v4 = vsel %vm956_vm5, %v945_v24, %v3078_v18  ;;  %v961_v46 = vsel %vm956_vm5, %v3074_v11, %v945_v24  ;;  %v929_v27 = vmul.f32 %v2867_v37, %v908_v26  ;;  %v930_v36 = vmul.f32 %v2867_v37, %v909_v14  ;;  %v3831_v24 = vld [vmem:[#allocation40_spill] sm:$0xff]  ;;  %v3832_v26 = vld [vmem:[#allocation41_spill] sm:$0xff] }
 0x1bc   : > { %v932_v43 = vadd.f32 %v924_v52, %v847_v56  ;;  %v935_v54 = vadd.f32 %v927_v47, %v850_v29  ;;  %v907_v13 = vmul.f32 %v3212_v63, %v879_v33  ;;  %v910_v1 = vmul.f32 %v3215_v50, %v873_v62 }
 0x1bd   : > { %v989_v5 = vmul.f32 %v3218_v57, %v961_v46  ;;  %v990_v41 = vmul.f32 %v3221_v58, %v959_v4  ;;  %v953_v9 = vpop.permute.xlu0 %952  ;;  %v937_v3 = vadd.f32 %v929_v27, %v852_v55  ;;  %v938_v20 = vadd.f32 %v930_v36, %v853_v10  ;;  %v947_v7 = vpop.permute.xlu1 %946  ;;  %v3833_v36 = vld [vmem:[#allocation9_spill] sm:$0xff] }
 0x1be   : > { %v957_v31 = vsel %vm956_vm5, %v3078_v18, %v953_v9  ;;  %v963_v34 = vsel %vm956_vm5, %v953_v9, %v3074_v11  ;;  %v928_v63 = vmul.f32 %v2867_v37, %v907_v13  ;;  %v931_v50 = vmul.f32 %v2867_v37, %v910_v1  ;;  %v3834_v13 = vld [vmem:[#allocation25_spill] sm:$0xff]  ;;  %v3836_v9 = vld [vmem:[#allocation42_spill] sm:$0xff] }
 0x1bf   : > { %v1010_v56 = vmul.f32 %v2871_v38, %v989_v5  ;;  %v1011_v29 = vmul.f32 %v2871_v38, %v990_v41  ;;  %v960_v51 = vsel %vm956_vm5, %v947_v7, %v3084_v23  ;;  %v962_v18 = vsel %vm956_vm5, %v3080_v19, %v947_v7  ;;  %v3835_v5 = vld [vmem:[#allocation23_spill] sm:$0xff] }
 0x1c0   : > { %v988_v25 = vmul.f32 %v3826_v2, %v963_v34  ;;  %v991_v11 = vmul.f32 %v3827_v0, %v957_v31  ;;  %v936_v8 = vadd.f32 %v928_v63, %v851_v6  ;;  %v939_v37 = vadd.f32 %v931_v50, %v854_v35 }
 0x1c1   : > { %v1018_v55 = vadd.f32 %v1010_v56, %v933_v42  ;;  %v1019_v10 = vadd.f32 %v1011_v29, %v934_v53  ;;  %v1030_v28 = vpop.permute.xlu0 %1029  ;;  %v993_v12 = vmul.f32 %v3218_v57, %v962_v18  ;;  %v994_v48 = vmul.f32 %v3221_v58, %v960_v51  ;;  %v955_v32 = vpop.permute.xlu1 %954  ;;  %v3829_v57 = vld [vmem:[#allocation21_spill] sm:$0xff] }
 0x1c2   : > { %v1009_v21 = vmul.f32 %v2871_v38, %v988_v25  ;;  %v1012_v22 = vmul.f32 %v2871_v38, %v991_v11  ;;  %v958_v17 = vsel %vm956_vm5, %v3084_v23, %v955_v32  ;;  %v964_v30 = vsel %vm956_vm5, %v955_v32, %v3080_v19 }
 0x1c3   : > { %v1044_v39 = vsel %vm1041_vm6, %v1030_v28, %v3828_v60  ;;  %v1046_v58 = vsel %vm1041_vm6, %v3829_v57, %v1030_v28  ;;  %v1014_v6 = vmul.f32 %v3830_v49, %v993_v12  ;;  %v1015_v38 = vmul.f32 %v3830_v49, %v994_v48  ;;  %v3840_v12 = vld [vmem:[#allocation10_spill] sm:$0xff] }
 0x1c4   : > { %v1017_v35 = vadd.f32 %v1009_v21, %v932_v43  ;;  %v1020_v42 = vadd.f32 %v1012_v22, %v935_v54  ;;  %v992_v23 = vmul.f32 %v3826_v2, %v964_v30  ;;  %v995_v53 = vmul.f32 %v3827_v0, %v958_v17 }
 0x1c5   : > { %v1073_v19 = vmul.f32 %v3831_v24, %v1046_v58  ;;  %v1074_v14 = vmul.f32 %v3832_v26, %v1044_v39  ;;  %v1038_v52 = vpop.permute.xlu0 %1037  ;;  %v1022_v47 = vadd.f32 %v1014_v6, %v937_v3  ;;  %v1023_v16 = vadd.f32 %v1015_v38, %v938_v20  ;;  %v1032_v62 = vpop.permute.xlu1 %1031  ;;  %v3837_v20 = vld [vmem:[#allocation43_spill] sm:$0xff] }
 0x1c6   : > { %v1042_v33 = vsel %vm1041_vm6, %v3828_v60, %v1038_v52  ;;  %v1048_v4 = vsel %vm1041_vm6, %v1038_v52, %v3829_v57  ;;  %v1013_v46 = vmul.f32 %v3830_v49, %v992_v23  ;;  %v1016_v27 = vmul.f32 %v3830_v49, %v995_v53  ;;  %v3841_v60 = vld [vmem:[#allocation44_spill] sm:$0xff]  ;;  %v3842_v57 = vld [vmem:[#allocation45_spill] sm:$0xff] }
 0x1c7   : > { %v1094_v43 = vmul.f32 %v3833_v36, %v1073_v19  ;;  %v1095_v54 = vmul.f32 %v3833_v36, %v1074_v14  ;;  %v1045_v1 = vsel %vm1041_vm6, %v1032_v62, %v3834_v13  ;;  %v1047_v41 = vsel %vm1041_vm6, %v3835_v5, %v1032_v62  ;;  %v3844_v14 = vld [vmem:[#allocation29_spill] sm:$0xff] }
 0x1c8   : > { %v1075_v3 = vmul.f32 %v3836_v9, %v1042_v33  ;;  %v1076_v7 = vmul.f32 %v3837_v20, %v1048_v4  ;;  %v1021_v31 = vadd.f32 %v1013_v46, %v936_v8  ;;  %v1024_v34 = vadd.f32 %v1016_v27, %v939_v37  ;;  %v3838_v8 = vld [vmem:[#allocation26_spill] sm:$0xff]  ;;  %v3847_v46 = vld [vmem:[#allocation47_spill] sm:$0xff] }
 0x1c9   : > { %v1102_v63 = vadd.f32 %v1094_v43, %v1017_v35  ;;  %v1103_v50 = vadd.f32 %v1095_v54, %v1018_v55  ;;  %v1115_v56 = vpop.permute.xlu0 %1114  ;;  %v1077_v29 = vmul.f32 %v3831_v24, %v1047_v41  ;;  %v1078_v51 = vmul.f32 %v3832_v26, %v1045_v1  ;;  %v1040_v25 = vpop.permute.xlu1 %1039  ;;  %v3839_v55 = vld [vmem:[#allocation24_spill] sm:$0xff]  ;;  %v3843_v24 = vld [vmem:[#allocation11_spill] sm:$0xff]  ;;  %v3846_v33 = vld [vmem:[#allocation46_spill] sm:$0xff] }
 0x1ca   : > { %v1096_v18 = vmul.f32 %v3833_v36, %v1075_v3  ;;  %v1097_v2 = vmul.f32 %v3833_v36, %v1076_v7  ;;  %v1043_v0 = vsel %vm1041_vm6, %v3834_v13, %v1040_v25  ;;  %v1049_v11 = vsel %vm1041_vm6, %v1040_v25, %v3835_v5 }
 0x1cb   : > { %v1129_v37 = vsel %vm1126_vm7, %v1115_v56, %v3838_v8  ;;  %v1131_v28 = vsel %vm1126_vm7, %v3839_v55, %v1115_v56  ;;  %v1098_v48 = vmul.f32 %v3840_v12, %v1077_v29  ;;  %v1099_v21 = vmul.f32 %v3840_v12, %v1078_v51  ;;  %v3850_v56 = vld [vmem:[#allocation12_spill] sm:$0xff] }
 0x1cc   : > { %v1104_v22 = vadd.f32 %v1096_v18, %v1019_v10  ;;  %v1105_v32 = vadd.f32 %v1097_v2, %v1020_v42  ;;  %v1079_v17 = vmul.f32 %v3836_v9, %v1043_v0  ;;  %v1080_v30 = vmul.f32 %v3837_v20, %v1049_v11  ;;  %v3851_v11 = vld [vmem:[#allocation48_spill] sm:$0xff] }
 0x1cd   : > { %v1158_v39 = vmul.f32 %v3841_v60, %v1131_v28  ;;  %v1159_v58 = vmul.f32 %v3842_v57, %v1129_v37  ;;  %v1123_v49 = vpop.permute.xlu0 %1122  ;;  %v1106_v6 = vadd.f32 %v1098_v48, %v1021_v31  ;;  %v1107_v38 = vadd.f32 %v1099_v21, %v1022_v47  ;;  %v1117_v35 = vpop.permute.xlu1 %1116  ;;  %v3845_v47 = vld [vmem:[#allocation27_spill] sm:$0xff]  ;;  %v3848_v31 = vld [vmem:[#allocation30_spill] sm:$0xff]  ;;  %v3852_v37 = vld [vmem:[#allocation49_spill] sm:$0xff] }
 0x1ce   : > { %v1127_v23 = vsel %vm1126_vm7, %v3838_v8, %v1123_v49  ;;  %v1133_v10 = vsel %vm1126_vm7, %v1123_v49, %v3839_v55  ;;  %v1100_v42 = vmul.f32 %v3840_v12, %v1079_v17  ;;  %v1101_v53 = vmul.f32 %v3840_v12, %v1080_v30 }
 0x1cf   : > { %v1179_v19 = vmul.f32 %v3843_v24, %v1158_v39  ;;  %v1180_v26 = vmul.f32 %v3843_v24, %v1159_v58  ;;  %v1130_v52 = vsel %vm1126_vm7, %v1117_v35, %v3844_v14  ;;  %v1132_v62 = vsel %vm1126_vm7, %v3845_v47, %v1117_v35  ;;  %v3854_v58 = vld [vmem:[#allocation34_spill] sm:$0xff] }
 0x1d0   : > { %v1160_v4 = vmul.f32 %v3846_v33, %v1127_v23  ;;  %v1161_v27 = vmul.f32 %v3847_v46, %v1133_v10  ;;  %v1108_v36 = vadd.f32 %v1100_v42, %v1023_v16  ;;  %v1109_v43 = vadd.f32 %v1101_v53, %v1024_v34  ;;  %v3856_v35 = vld [vmem:[#allocation50_spill] sm:$0xff] }
 0x1d1   : > { %v1187_v54 = vadd.f32 %v1179_v19, %v1102_v63  ;;  %v1188_v13 = vadd.f32 %v1180_v26, %v1103_v50  ;;  %v1200_v1 = vpop.permute.xlu0 %1199  ;;  %v1162_v5 = vmul.f32 %v3841_v60, %v1132_v62  ;;  %v1163_v41 = vmul.f32 %v3842_v57, %v1130_v52  ;;  %v1125_v20 = vpop.permute.xlu1 %1124  ;;  %v3849_v63 = vld [vmem:[#allocation28_spill] sm:$0xff]  ;;  %v3853_v60 = vld [vmem:[#allocation13_spill] sm:$0xff] }
 0x1d2   : > { %v1181_v9 = vmul.f32 %v3843_v24, %v1160_v4  ;;  %v1182_v3 = vmul.f32 %v3843_v24, %v1161_v27  ;;  %v1128_v7 = vsel %vm1126_vm7, %v3844_v14, %v1125_v20  ;;  %v1134_v16 = vsel %vm1126_vm7, %v1125_v20, %v3845_v47  ;;  %v3857_v27 = vld [vmem:[#allocation35_spill] sm:$0xff] }
 0x1d3   : > { %v1214_v34 = vsel %vm1211_vm8, %v1200_v1, %v3848_v31  ;;  %v1216_v50 = vsel %vm1211_vm8, %v3849_v63, %v1200_v1  ;;  %v1183_v29 = vmul.f32 %v3850_v56, %v1162_v5  ;;  %v1184_v51 = vmul.f32 %v3850_v56, %v1163_v41 }
 0x1d4   : > { %v1189_v18 = vadd.f32 %v1181_v9, %v1104_v22  ;;  %v1190_v2 = vadd.f32 %v1182_v3, %v1105_v32  ;;  %v1164_v25 = vmul.f32 %v3846_v33, %v1128_v7  ;;  %v1165_v0 = vmul.f32 %v3847_v46, %v1134_v16 }
 0x1d5   : > { %v1243_v8 = vmul.f32 %v3851_v11, %v1216_v50  ;;  %v1244_v55 = vmul.f32 %v3852_v37, %v1214_v34  ;;  %v1208_v28 = vpop.permute.xlu0 %1207  ;;  %v1191_v12 = vadd.f32 %v1183_v29, %v1106_v6  ;;  %v1192_v48 = vadd.f32 %v1184_v51, %v1107_v38  ;;  %v1202_v21 = vpop.permute.xlu1 %1201  ;;  %v3855_v6 = vld [vmem:[#allocation31_spill] sm:$0xff] }
 0x1d6   : > { %v1212_v17 = vsel %vm1211_vm8, %v3848_v31, %v1208_v28  ;;  %v1218_v22 = vsel %vm1211_vm8, %v1208_v28, %v3849_v63  ;;  %v1185_v32 = vmul.f32 %v3850_v56, %v1164_v25  ;;  %v1186_v30 = vmul.f32 %v3850_v56, %v1165_v0  ;;  %v3861_v0 = vld [vmem:[#allocation37_spill] sm:$0xff] }
 0x1d7   : > { %v1264_v39 = vmul.f32 %v3853_v60, %v1243_v8  ;;  %v1265_v57 = vmul.f32 %v3853_v60, %v1244_v55  ;;  %v1215_v49 = vsel %vm1211_vm8, %v1202_v21, %v3854_v58  ;;  %v1217_v38 = vsel %vm1211_vm8, %v3855_v6, %v1202_v21  ;;  %v3862_v8 = vld [vmem:[#allocation36_spill] sm:$0xff] }
 0x1d8   : > { %v1245_v23 = vmul.f32 %v3856_v35, %v1212_v17  ;;  %v1246_v10 = vmul.f32 %v3297_v40, %v1218_v22  ;;  %v1193_v42 = vadd.f32 %v1185_v32, %v1108_v36  ;;  %v1194_v53 = vadd.f32 %v1186_v30, %v1109_v43  ;;  %v3858_v43 = vld [vmem:[#allocation33_spill] sm:$0xff] }
 0x1d9   : > { %v1272_v24 = vadd.f32 %v1264_v39, %v1187_v54  ;;  %v1273_v19 = vadd.f32 %v1265_v57, %v1188_v13  ;;  %v1285_v26 = vpop.permute.xlu0 %1284  ;;  %v1247_v14 = vmul.f32 %v3851_v11, %v1217_v38  ;;  %v1248_v52 = vmul.f32 %v3852_v37, %v1215_v49  ;;  %v1210_v33 = vpop.permute.xlu1 %1209  ;;  %v3859_v13 = vld [vmem:[#allocation14_spill] sm:$0xff]  ;;  %v3863_v38 = vld [vmem:[#allocation16_spill] sm:$0xff] }
 0x1da   : > { %v1266_v47 = vmul.f32 %v3853_v60, %v1245_v23  ;;  %v1267_v62 = vmul.f32 %v3853_v60, %v1246_v10  ;;  %v1213_v4 = vsel %vm1211_vm8, %v3854_v58, %v1210_v33  ;;  %v1219_v46 = vsel %vm1211_vm8, %v1210_v33, %v3855_v6 }
 0x1db   : > { %v1299_v36 = vsel %vm1296_vm9, %v1285_v26, %v3857_v27  ;;  %v1301_v54 = vsel %vm1296_vm9, %v3858_v43, %v1285_v26  ;;  %v1268_v1 = vmul.f32 %v3859_v13, %v1247_v14  ;;  %v1269_v5 = vmul.f32 %v3859_v13, %v1248_v52 }
 0x1dc   : > { %v1274_v41 = vadd.f32 %v1266_v47, %v1189_v18  ;;  %v1275_v9 = vadd.f32 %v1267_v62, %v1190_v2  ;;  %v1249_v3 = vmul.f32 %v3856_v35, %v1213_v4  ;;  %v1250_v20 = vmul.f32 %v3297_v40, %v1219_v46  ;;  %v3860_v18 = vld [vmem:[#allocation15_spill] sm:$0xff] }
 0x1dd   : > { %v1328_v7 = vmul.f32 %v3300_v59, %v1301_v54  ;;  %v1329_v16 = vmul.f32 %v3303_v44, %v1299_v36  ;;  %v1293_v31 = vpop.permute.xlu0 %1292  ;;  %v1276_v34 = vadd.f32 %v1268_v1, %v1191_v12  ;;  %v1277_v63 = vadd.f32 %v1269_v5, %v1192_v48  ;;  %v1287_v50 = vpop.permute.xlu1 %1286 }
 0x1de   : > { %v1297_v56 = vsel %vm1296_vm9, %v3857_v27, %v1293_v31  ;;  %v1303_v29 = vsel %vm1296_vm9, %v1293_v31, %v3858_v43  ;;  %v1270_v51 = vmul.f32 %v3859_v13, %v1249_v3  ;;  %v1271_v40 = vmul.f32 %v3859_v13, %v1250_v20 }
 0x1df   : > { %v1349_v2 = vmul.f32 %v3860_v18, %v1328_v7  ;;  %v1350_v25 = vmul.f32 %v3860_v18, %v1329_v16  ;;  %v1300_v11 = vsel %vm1296_vm9, %v1287_v50, %v3861_v0  ;;  %v1302_v37 = vsel %vm1296_vm9, %v3862_v8, %v1287_v50 }
 0x1e0   : > { %v1330_v55 = vmul.f32 %v3306_v45, %v1297_v56  ;;  %v1331_v28 = vmul.f32 %v3328_v15, %v1303_v29  ;;  %v1278_v12 = vadd.f32 %v1270_v51, %v1193_v42  ;;  %v1279_v48 = vadd.f32 %v1271_v40, %v1194_v53 }
 0x1e1   : > { %v1357_v21 = vadd.f32 %v1349_v2, %v1272_v24  ;;  %v1358_v17 = vadd.f32 %v1350_v25, %v1273_v19  ;;  %v1332_v22 = vmul.f32 %v3300_v59, %v1302_v37  ;;  %v1333_v32 = vmul.f32 %v3303_v44, %v1300_v11  ;;  %v1295_v39 = vpop.permute.xlu1 %1294 }
 0x1e2   : > { %v1351_v30 = vmul.f32 %v3860_v18, %v1330_v55  ;;  %v1352_v60 = vmul.f32 %v3860_v18, %v1331_v28  ;;  %v1298_v49 = vsel %vm1296_vm9, %v3861_v0, %v1295_v39  ;;  %v1304_v6 = vsel %vm1296_vm9, %v1295_v39, %v3862_v8 }
 0x1e3   : > { %v1365_v57 = vadd.f32 3.0, %v1357_v21  ;;  %v1366_v58 = vadd.f32 3.0, %v1358_v17  ;;  %v1353_v35 = vmul.f32 %v3863_v38, %v1332_v22  ;;  %v1354_v59 = vmul.f32 %v3863_v38, %v1333_v32 }
 0x1e4   : > { %v1359_v44 = vadd.f32 %v1351_v30, %v1274_v41  ;;  %v1360_v23 = vadd.f32 %v1352_v60, %v1275_v9  ;;  %v1334_v42 = vmul.f32 %v3306_v45, %v1298_v49  ;;  %v1335_v53 = vmul.f32 %v3328_v15, %v1304_v6 }
 0x1e5   : > { %v1373_v10 = vmax.f32 %v1365_v57, 0.0  ;;  %v1374_v24 = vmax.f32 %v1366_v58, 0.0  ;;  %v1361_v19 = vadd.f32 %v1353_v35, %v1276_v34  ;;  %v1362_v26 = vadd.f32 %v1354_v59, %v1277_v63 }
 0x1e6   : > { %v1367_v14 = vadd.f32 3.0, %v1359_v44  ;;  %v1368_v52 = vadd.f32 3.0, %v1360_v23  ;;  %v1355_v61 = vmul.f32 %v3863_v38, %v1334_v42  ;;  %v1356_v62 = vmul.f32 %v3863_v38, %v1335_v53 }
 0x1e7   : > { %v1381_v47 = vmin.f32 %v1373_v10, 6.0  ;;  %v1382_v33 = vmin.f32 %v1374_v24, 6.0  ;;  %v1369_v4 = vadd.f32 3.0, %v1361_v19  ;;  %v1370_v46 = vadd.f32 3.0, %v1362_v26 }
 0x1e8   : > { %v1375_v27 = vmax.f32 %v1367_v14, 0.0  ;;  %v1376_v36 = vmax.f32 %v1368_v52, 0.0  ;;  %v1363_v43 = vadd.f32 %v1355_v61, %v1278_v12  ;;  %v1364_v54 = vadd.f32 %v1356_v62, %v1279_v48 }
 0x1e9   : > { %v1377_v45 = vmax.f32 %v1369_v4, 0.0  ;;  %v1378_v13 = vmax.f32 %v1370_v46, 0.0  ;;  %v1389_v15 = vmul.f32 %v1381_v47, %v1357_v21  ;;  %v1390_v20 = vmul.f32 %v1382_v33, %v1358_v17 }
 0x1ea   : > { %v1383_v1 = vmin.f32 %v1375_v27, 6.0  ;;  %v1371_v5 = vadd.f32 3.0, %v1363_v43  ;;  %v1372_v41 = vadd.f32 3.0, %v1364_v54  ;;  %v1384_v7 = vmin.f32 %v1376_v36, 6.0  ;;  %v1755_v14 = vpop.permute.xlu0 %1754 }
 0x1eb   : > { %v1385_v9 = vmin.f32 %v1377_v45, 6.0  ;;  %v1386_v3 = vmin.f32 %v1378_v13, 6.0  ;;  %v3617_v50 = vmul.f32 0.16666667, %v1389_v15  ;;  %v3621_v18 = vmul.f32 0.16666667, %v1390_v20 }
 0x1ec   : > { %v1379_v16 = vmax.f32 %v1371_v5, 0.0  ;;  %v1380_v31 = vmax.f32 %v1372_v41, 0.0  ;;  %v1391_v56 = vmul.f32 %v1383_v1, %v1359_v44  ;;  %v1392_v25 = vmul.f32 %v1384_v7, %v1360_v23  ;;  %v2297_v15 = vld.sshfl [vmem:[%s3720_s3] sm:$0x33 pattern:$0x75316420] }
 0x1ed   : > { %v1393_v34 = vmul.f32 %v1385_v9, %v1361_v19  ;;  %v1394_v63 = vmul.f32 %v1386_v3, %v1362_v26  ;;  %v2534_v22 = vmov 0.0   ;;  %v1749_v19 = vld [vmem:[%s3724_s7] sm:$0x3]  ;;  %v3864_v26 = vmov 0  }
 0x1ee   : > { %v1387_v29 = vmin.f32 %v1379_v16, 6.0  ;;  %v1388_v51 = vmin.f32 %v1380_v31, 6.0  ;;  %v3629_v55 = vmul.f32 0.16666667, %v1391_v56  ;;  %v3633_v12 = vmul.f32 0.16666667, %v1392_v25  ;;  %2359 = vmatprep.subr.bf16.mxu0 %v2534_v22  ;;  %2365 = vmatprep.subr.bf16.mxu1 %v2534_v22  ;;  %v1816_v25 = vpop.permute.xlu0 %1815 }
 0x1ef   : > { %v3619_v40 = vmul.f32 0.16666667, %v1393_v34  ;;  %v3623_v2 = vmul.f32 0.16666667, %v1394_v63  ;;  %v1892_v1 = vcombine.high %v2297_v15, %v2297_v15  ;;  %v3865_v5 = vld [vmem:[#allocation32_spill] sm:$0xff]  ;;  %v1811_v34 = vpop.permute.xlu1 %1810 }
 0x1f0   : > { %v1395_v0 = vmul.f32 %v1387_v29, %v1363_v43  ;;  %v1396_v11 = vmul.f32 %v1388_v51, %v1364_v54  ;;  %v2462_v43 = vld [vmem:[%s3726_s9] sm:$0xff]   ;;  %v2536_v54 = vmov 1966171168  }
 0x1f1   : > { %v1405_v8 = vpack.c.bf16 %v3619_v40, %v3617_v50  ;;  %v1406_v37 = vpack.c.bf16 %v3623_v2, %v3621_v18  ;;  %v1894_v45 = vunpack.c.l.s4 %v2536_v54 }
 0x1f2   : > { %v3631_v28 = vmul.f32 0.16666667, %v1395_v0  ;;  %v3635_v48 = vmul.f32 0.16666667, %v1396_v11 }
 0x1f3   : > { %1697 = vmatprep.mubr.bf16.mxu0 %v1406_v37  ;;  %v1895_v13 = vunpack.c.0.s8 %v1894_v45 }
 0x1f4   : > { %v1407_v21 = vpack.c.bf16 %v3631_v28, %v3629_v55  ;;  %1698 = vmatmul.mubr.bf16.vlgmr.msra.gmra.mxu0 %v1405_v8  ;;  %v1408_v17 = vpack.c.bf16 %v3635_v48, %v3633_v12 }
 0x1f5   : > { %2361 = vmatprep.mubr.msk.bf16.mxu0 %vm2535_vm10, %v2534_v22  ;;  %v1898_v41 = vsub.s32 %v1895_v13, %v3865_v5 }
 0x1f6   : > { %1738 = vmatprep.mubr.bf16.mxu1 %v1408_v17 }
 0x1f7   : > { %1739 = vmatmul.mubr.bf16.vlgmr.msra.gmra.mxu1 %v1407_v21  ;;  %v1906_v9 = vrot.slane %v1892_v1, %v1898_v41  ;;  %v1899_v3 = vrot.slane %v2297_v15, %v1898_v41 }
 0x1f8   : > { %2367 = vmatprep.mubr.msk.bf16.mxu1 %vm2535_vm10, %v2534_v22 }
 0x1f9   : > { %v1908_v20 = vcombine.high %v1906_v9, %v1906_v9  ;;  %v1907_v7 = vcombine.high %v1899_v3, %v1899_v3  ;;  %v1915_v16 = vsel %vm1913_vm14, %v1899_v3, 0  ;;  %v461_v3 = vpop.permute.xlu0 %460 }
 0x1fb   : > { %v1921_v31 = vsel %vm1913_vm14, %v1907_v7, 0 }
 0x2b4   : > { %v2327_v32 = vpop.f32.mrf.mxu0 }
 0x2b6   : > { %v2328_v30 = vpop.f32.mrf.mxu0 }
 0x2b7   : > { %v2349_v39 = vpop.f32.mrf.mxu1  ;;  %v2329_v38 = vadd.f32 %v2328_v30, %v2327_v32 }
 0x2b8   : > { %v2330_v60 = vpop.f32.mrf.mxu0 }
 0x2b9   : > { %v2350_v57 = vpop.f32.mrf.mxu1 }
 0x2ba   : > { %v2351_v58 = vadd.f32 %v2350_v57, %v2349_v39  ;;  %v2331_v49 = vpop.f32.mrf.mxu0 }
 0x2bb   : > { %v2352_v6 = vpop.f32.mrf.mxu1  ;;  %v2332_v59 = vadd.f32 %v2331_v49, %v2330_v60 }
 0x2bc   : > { %v1741_v44 = vadd.f32 %v2351_v58, %v2329_v38 }
 0x2bd   : > { %v2353_v35 = vpop.f32.mrf.mxu1 }
 0x2be   : > { %v2354_v23 = vadd.f32 %v2353_v35, %v2352_v6  ;;  %v1747_v42 = vmul.f32 0.00390625, %v1741_v44 }
 0x2c0   : > { %v1744_v10 = vadd.f32 %v2354_v23, %v2332_v59 }
 0x2c2   : > { %v1748_v53 = vmul.f32 0.00390625, %v1744_v10 }
 0x2c4   : > { %v1750_v24 = vpack.c.bf16 %v1748_v53, %v1747_v42 }
 0x2c6   : > { %2360 = vmatpush3.bf16.msra.mxu0 %v1750_v24 }
 0x2c7   : > { %2298 = vmatprep.subr.msk.bf16.mxu0 %vm1913_vm14, %v1906_v9 }
 0x2c9   : > { %2362 = vmatmul.mubr.msk.bf16.vlgmr.msra.gmra.mxu0 %vm1757_vm11, %v1749_v19 }
 0x2ca   : > { %1958 = vmatprep.mubr.bf16.mxu0 %v3864_v26  ;;  %1941 = vmatpush1.bf16.msra.mxu0 %v1915_v16 }
 0x389   : > { %v1795_v52 = vpop.f32.mrf.mxu0 }
 0x38a   : > { %v1796_v47 = vadd.f32 %v1795_v52, %v1755_v14 }
 0x38b   : > { %v2363_v61 = vpop.f32.mrf.mxu0 }
 0x38c   : > { %v1801_v62 = vmax.f32 %v1796_v47, 0.0 }
 0x38d   : > { %v1798_v33 = vpop.f32.mrf.mxu0 }
 0x38e   : > { %v1802_v4 = vmin.f32 %v1801_v62, 6.0 }
 0x38f   : > { %v2364_v46 = vpop.f32.mrf.mxu0 }
 0x390   : > { %v1805_v27 = vpack.c.bf16 %v1802_v4, %v1802_v4 }
 0x392   : > { %v1829_v36 = vsel %vm1827_vm12, %v1805_v27, 0 }
 0x393   : > { %2366 = vmatpush3.bf16.msra.mxu1 %v1829_v36 }
 0x394   : > { %2300 = vmatprep.subr.msk.bf16.mxu1 %vm1913_vm14, %v1908_v20 }
 0x396   : > { %2368 = vmatmul.mubr.msk.bf16.vlgmr.msra.gmra.mxu1 %vm1823_vm13, %v2462_v43 }
 0x397   : > { %2001 = vmatprep.mubr.bf16.mxu1 %v3864_v26  ;;  %1984 = vmatpush1.bf16.msra.mxu1 %v1921_v31 }
 0x456   : > { %v1865_v63 = vpop.f32.mrf.mxu1 }
 0x457   : > { %v1866_v56 = vadd.f32 %v1865_v63, %v1811_v34 }
 0x458   : > { %v2369_v29 = vpop.f32.mrf.mxu1 }
 0x459   : > { %v1872_v51 = vadd.f32 3.0, %v1866_v56 }
 0x45a   : > { %v1868_v0 = vpop.f32.mrf.mxu1 }
 0x45b   : > { %v1874_v11 = vmax.f32 %v1872_v51, 0.0  ;;  %v1869_v8 = vadd.f32 %v1868_v0, %v1816_v25  ;;  %v3866_v51 = vld [vmem:[#allocation17_spill] sm:$0xff]  ;;  %v3867_v0 = vld [vmem:[#allocation18_spill] sm:$0xff] }
 0x45c   : > { %v2370_v37 = vpop.f32.mrf.mxu1  ;;  %v546_v25 = vadd.f32 %v3866_v51, %v461_v3 }
 0x45d   : > { %v1876_v21 = vmin.f32 %v1874_v11, 6.0  ;;  %v1873_v17 = vadd.f32 3.0, %v1869_v8  ;;  %v597_v11 = vadd.f32 %v3867_v0, %v461_v3 }
 0x45f   : > { %v1875_v22 = vmax.f32 %v1873_v17, 0.0  ;;  %v1878_v32 = vmul.f32 %v1876_v21, %v1866_v56 }
 0x461   : > { %v1877_v30 = vmin.f32 %v1875_v22, 6.0  ;;  %v1880_v39 = vmul.f32 0.16666667, %v1878_v32  ;;  %v3868_v22 = vld [vmem:[#allocation19_spill] sm:$0xff] }
 0x462   : > { %v548_v32 = vadd.f32 %v3868_v22, %v461_v3 }
 0x463   : > { %v1879_v60 = vmul.f32 %v1877_v30, %v1869_v8  ;;  %v3869_v30 = vld [vmem:[#allocation20_spill] sm:$0xff] }
 0x465   : > { %v1881_v57 = vmul.f32 0.16666667, %v1879_v60  ;;  %v599_v60 = vadd.f32 %v3869_v30, %v461_v3 }
 0x467   : > { %v1882_v58 = vpack.c.bf16 %v1881_v57, %v1880_v39 }
 0x469   : > { %2299 = vmatmul.mubr.msk.bf16.vlgmr.msra.gmra.mxu0 %vm1909_vm15, %v1882_v58  ;;  %2301 = vmatmul.mubr.msk.bf16.vlgmr.msra.gmra.mxu1 %vm1909_vm15, %v1882_v58 }
 0x46a   : > { %2066 = vmatprep.mubr.bf16.mxu0 %v3864_v26  ;;  %2107 = vmatprep.mubr.bf16.mxu1 %v3864_v26 }
 0x529   : > { %v1960_v49 = vpop.f32.mrf.mxu0  ;;  %v2003_v6 = vpop.f32.mrf.mxu1 }
 0x52a   : > { %v2012_v52 = vmul.f32 %v1960_v49, %v3617_v50  ;;  %v2014_v47 = vmul.f32 %v2003_v6, %v3629_v55  ;;  %v2029_v50 = vpop.permute.xlu1 %2028 }
 0x52b   : > { %v1962_v38 = vpop.f32.mrf.mxu0  ;;  %v2005_v35 = vpop.f32.mrf.mxu1 }
 0x52c   : > { %v2013_v24 = vmul.f32 %v1962_v38, %v3621_v18  ;;  %v2015_v19 = vmul.f32 %v2005_v35, %v3633_v12  ;;  %v2020_v18 = vld [vmem:[%s3728_s11] sm:$0xf] }
 0x52d   : > { %v1964_v59 = vpop.f32.mrf.mxu0  ;;  %v2007_v44 = vpop.f32.mrf.mxu1 }
 0x52e   : > { %v2016_v23 = vmul.f32 %v1964_v59, %v3619_v40  ;;  %v2018_v10 = vmul.f32 %v2007_v44, %v3631_v28 }
 0x52f   : > { %v1966_v42 = vpop.f32.mrf.mxu0  ;;  %v2009_v53 = vpop.f32.mrf.mxu1 }
 0x530   : > { %v2017_v14 = vmul.f32 %v1966_v42, %v3623_v2  ;;  %v2019_v26 = vmul.f32 %v2009_v53, %v3635_v48  ;;  %v2021_v33 = vpack.c.bf16 %v2016_v23, %v2012_v52  ;;  %v2023_v40 = vpack.c.bf16 %v2018_v10, %v2014_v47 }
 0x532   : > { %v2022_v61 = vpack.c.bf16 %v2017_v14, %v2013_v24  ;;  %v2024_v62 = vpack.c.bf16 %v2019_v26, %v2015_v19 }
 0x534   : > { %2048 = vmatprep.subr.bf16.mxu0 %v2022_v61  ;;  %2089 = vmatprep.subr.bf16.mxu1 %v2024_v62 }
 0x535   : > { %2049 = vmatpush1.bf16.msra.mxu0 %v2021_v33  ;;  %2090 = vmatpush1.bf16.msra.mxu1 %v2023_v40 }
 0x538   : > { %2302 = vmatmul.mubr.msk.bf16.vlgmr.msra.gmra.mxu0 %vm1757_vm11, %v2020_v18  ;;  %2303 = vmatmul.mubr.msk.bf16.vlgmr.msra.gmra.mxu1 %vm1757_vm11, %v2020_v18 }
 0x5f8   : > { %v2068_v2 = vpop.f32.mrf.mxu0  ;;  %v2109_v55 = vpop.f32.mrf.mxu1 }
 0x5f9   : > { %v2069_v28 = vadd.f32 %v2068_v2, %v2029_v50  ;;  %v2110_v12 = vadd.f32 %v2109_v55, %v2029_v50 }
 0x5fa   : > { %v2070_v48 = vpop.f32.mrf.mxu0  ;;  %v2111_v4 = vpop.f32.mrf.mxu1 }
 0x5fb   : > { %v2116_v46 = vadd.f32 3.0, %v2069_v28  ;;  %v2118_v27 = vadd.f32 3.0, %v2110_v12  ;;  %v2071_v36 = vadd.f32 %v2070_v48, %v2029_v50  ;;  %v2112_v43 = vadd.f32 %v2111_v4, %v2029_v50 }
 0x5fc   : > { %v2072_v54 = vpop.f32.mrf.mxu0  ;;  %v2113_v45 = vpop.f32.mrf.mxu1 }
 0x5fd   : > { %v2120_v13 = vmax.f32 %v2116_v46, 0.0  ;;  %v2122_v15 = vmax.f32 %v2118_v27, 0.0  ;;  %v2117_v1 = vadd.f32 3.0, %v2071_v36  ;;  %v2119_v5 = vadd.f32 3.0, %v2112_v43 }
 0x5fe   : > { %v2073_v41 = vpop.f32.mrf.mxu0  ;;  %v2114_v9 = vpop.f32.mrf.mxu1 }
 0x5ff   : > { %v2124_v20 = vmin.f32 %v2120_v13, 6.0  ;;  %v2126_v7 = vmin.f32 %v2122_v15, 6.0  ;;  %v2121_v16 = vmax.f32 %v2117_v1, 0.0  ;;  %v2123_v31 = vmax.f32 %v2119_v5, 0.0 }
 0x601   : > { %v2128_v34 = vmul.f32 %v2124_v20, %v2069_v28  ;;  %v2130_v63 = vmul.f32 %v2126_v7, %v2110_v12  ;;  %v2125_v56 = vmin.f32 %v2121_v16, 6.0  ;;  %v2127_v29 = vmin.f32 %v2123_v31, 6.0 }
 0x603   : > { %v2132_v8 = vmul.f32 0.16666667, %v2128_v34  ;;  %v2134_v37 = vmul.f32 0.16666667, %v2130_v63  ;;  %v2129_v21 = vmul.f32 %v2125_v56, %v2071_v36  ;;  %v2131_v17 = vmul.f32 %v2127_v29, %v2112_v43 }
 0x605   : > { %v2136_v39 = vadd.f32 %v2132_v8, %v546_v25  ;;  %v2138_v57 = vadd.f32 %v2134_v37, %v597_v11  ;;  %v2133_v58 = vmul.f32 0.16666667, %v2129_v21  ;;  %v2135_v49 = vmul.f32 0.16666667, %v2131_v17 }
 0x607   : > { %2140 = vst [vmem:[%s433_s24] sm:$0xff] %v2136_v39  ;;  %2142 = vst [vmem:[%s433_s24 + $0x10] sm:$0xff] %v2138_v57  ;;  %v2137_v6 = vadd.f32 %v2133_v58, %v548_v32  ;;  %v2139_v38 = vadd.f32 %v2135_v49, %v599_v60 }
 0x609   : > { %2141 = vst [vmem:[%s433_s24 + $0x8] sm:$0xff] %v2137_v6  ;;  %2143 = vst [vmem:[%s433_s24 + $0x18] sm:$0xff] %v2139_v38 }
 0x60a   : > { %2476 = shalt.err (!%p2473_p3)
}
 0x60b   : > { %s2477_s23 = scalar_lea.hbm %s3680_s20, 512  ;;  %s2481_s15 = scalar_lea.hbm %s3730_s13, 1024 }
 0x60c   : > { %p2478_p4 = scmp.ne.s32.totalorder %s3680_s20, %s2477_s23  ;;  %p2482_p9 = scmp.lt.s32.totalorder %s3680_s20, %s3730_s13 }
 0x60d   : > { %p2483_p10 = scmp.lt.s32.totalorder %s2481_s15, %s2477_s23 }
 0x60e   : > { %p2479_p7 = pnand %p2478_p4, %p2646_p5 }
 0x60f   : > { %p2484_p11 = por %p2483_p10, %p2482_p9 }
 0x610   : > { %p2480_p8 = pneg %p2479_p7 }
 0x612   : > { %p2485_p12 = pnand %p2484_p11, %p2480_p8 }
 0x614   : > { %2488 = shalt.err (!%p2485_p12)
}
 0x615   : > { %2371 = dma.vmem_to_hbm [thread:$0]  (%p2646_p5), %s2160_s30, 512, %s3680_s20, %s2145_s29  }
 0x616 PF: > { %p2377_p13 = scmp.ge.s32.totalorder %s2523_s28, 2  ;;  %s2171_s22 = sand.u32 1, %s2511_s25  }
 0x617   : > { %s2172_s27 = scalar_lea.sflag [#allocation3], %s2171_s22 }
 0x618   : > { %p2374_p0 = pnand %p2377_p13, %p2650_p6 }
 0x61a   : > { %p2375_p1 = pneg %p2374_p0 }
 0x61c   : > { %2506 = dma.done.wait (%p2375_p1), %s2172_s27, 512  }
 0x61d   : > { %2508 = vsyncadd (%p2375_p1), %s2172_s27, 4294966784  ;;  %s3870_s28 = sld [smem:[#allocation6_spill]]  ;;  %s3873_s25 = smov %s2515_s26 }
 0x61e   : > { %s3871_s17 = sld [smem:[#allocation5_spill]] }
 0x61f   : > { %s3872_s27 = sld [smem:[#allocation7_spill]] }
 0x623   : > { %p23_p2 = scmp.ge.s32.totalorder %s3870_s28, 4  }
 0x624   : > { %s3874_s26 = smov %s3871_s17 }
 0x625   :  { %25 = sbr.rel (!%p23_p2) target bundleno = 3 (0x3), region = 123 }
 0x62a   :  { %2177 = vsyncpa [#allocation3], 1 }
 0x62b   :  { %2179 = vsyncpa [#allocation3 + $0x1], 1 }

</bundles_post_ra>
